<compile_context>
chip_gen: v7x
topology: tpu7x:2x2x1
jax: 0.10.0
libtpu: 0.0.40
codegen_flags: <defaults>
</compile_context>

<pallas_src>
import functools

import jax
import jax.numpy as jnp
from jax.experimental import pallas as pl
from jax.experimental.pallas import tpu as pltpu

EPS = 1e-5  # nn.LayerNorm default eps


def _layernorm(x, gamma, beta):
    # f32 statistics, biased variance + eps inside rsqrt (matches nn.LayerNorm).
    mean = jnp.mean(x, axis=-1, keepdims=True)
    var = jnp.mean(jnp.square(x - mean), axis=-1, keepdims=True)
    return (x - mean) * jax.lax.rsqrt(var + EPS) * gamma + beta


def encoder_layer_kernel(x_ref,
                         ln1_g_ref, ln1_b_ref,
                         wq_ref, wk_ref, wv_ref, wo_ref, bo_ref,
                         ln2_g_ref, ln2_b_ref,
                         w1_ref, b1_ref, w2_ref, b2_ref,
                         o_ref, *, heads, dim_head):
    """One encoder layer (MSA + residual, FFN + residual) for a block of Bb batch rows."""
    Bb, N, D = x_ref.shape
    d = dim_head
    BH = Bb * heads
    scale = d ** -0.5

    x = x_ref[...].astype(jnp.float32)                 # (Bb, N, D), residual kept in f32
    xf = x.reshape(Bb * N, D)

    # ---------------- MSA ----------------
    xn = _layernorm(xf, ln1_g_ref[...], ln1_b_ref[...])             # f32 (Bb*N, D)

    # Head-major Q/K/V via per-head weights: avoids slicing the lane axis of a
    # (N, 3E) result and avoids any in-kernel transposes. All matmuls below are
    # single-leading-batch-dim dot_generals (batch = Bb*heads), bf16 in, f32 acc.
    xb = jnp.broadcast_to(xn.reshape(Bb, 1, N, D), (Bb, heads, N, D))
    xb = xb.reshape(BH, N, D).astype(jnp.bfloat16)                   # hoisted once

    def rep(w):                                        # (heads, A, C) -> (BH, A, C)
        if Bb == 1:
            return w
        return jnp.broadcast_to(w[None], (Bb,) + w.shape).reshape((BH,) + w.shape[1:])

    wq = rep(wq_ref[...])
    wk = rep(wk_ref[...])
    wv = rep(wv_ref[...])

    dn_proj = (((2,), (1,)), ((0,), (0,)))             # contract last-of-lhs with dim1-of-rhs
    q = jax.lax.dot_general(xb, wq, dn_proj, preferred_element_type=jnp.float32)
    k = jax.lax.dot_general(xb, wk, dn_proj, preferred_element_type=jnp.float32)
    v = jax.lax.dot_general(xb, wv, dn_proj, preferred_element_type=jnp.float32)

    # Fold 1/sqrt(d) into q: O(N*d) multiplies instead of O(N*N).
    q = (q * scale).astype(jnp.bfloat16)
    k = k.astype(jnp.bfloat16)
    v = v.astype(jnp.bfloat16)

    dn_qkT = (((2,), (2,)), ((0,), (0,)))              # q . k^T over dim_head
    s = jax.lax.dot_general(q, k, dn_qkT, preferred_element_type=jnp.float32)   # (BH, N, N)

    # Softmax with f32 statistics; normalization deferred until after the PV matmul.
    m = jnp.max(s, axis=-1, keepdims=True)
    p = jnp.exp(s - m)
    l = jnp.sum(p, axis=-1, keepdims=True)

    o = jax.lax.dot_general(p.astype(jnp.bfloat16), v, dn_proj,
                            preferred_element_type=jnp.float32)                 # (BH, N, d)
    o = o * pl.reciprocal(l, approx=True)              # EUP slot, keeps VALU free

    # Output projection: per-head (N, d) @ (d, D) then sum over heads — identical to
    # rearrange('b h n d -> b n (h d)') followed by Linear(E, D), with no concat.
    wo = rep(wo_ref[...])                              # (BH, d, D)
    proj = jax.lax.dot_general(o.astype(jnp.bfloat16), wo, dn_proj,
                               preferred_element_type=jnp.float32)              # (BH, N, D)
    proj = jnp.sum(proj.reshape(Bb, heads, N, D), axis=1)                       # (Bb, N, D)
    x = x + proj + bo_ref[...]                         # residual (+ to_out bias)

    # ---------------- FeedForward ----------------
    xf = x.reshape(Bb * N, D)
    xn2 = _layernorm(xf, ln2_g_ref[...], ln2_b_ref[...])
    h1 = jnp.dot(xn2.astype(jnp.bfloat16), w1_ref[...],
                 preferred_element_type=jnp.float32) + b1_ref[...]
    # exact GELU (nn.GELU default): 0.5*x*(1+erf(x/sqrt(2))), computed in f32
    h1 = 0.5 * h1 * (1.0 + jax.lax.erf(h1 * 0.7071067811865476))
    h2 = jnp.dot(h1.astype(jnp.bfloat16), w2_ref[...],
                 preferred_element_type=jnp.float32) + b2_ref[...]
    o_ref[...] = (x + h2.reshape(Bb, N, D)).astype(o_ref.dtype)

    # Dropouts are identity (p=0 / eval); the outer self.norm defined in __init__ is
    # never applied in forward() and is therefore omitted.
    # TODO(synk): for long sequences, tile KV flash-style (online softmax over an
    # "arbitrary" kv-block grid axis) instead of materializing the (BH, N, N) scores.


_PARAM_ORDER = ("ln1_g", "ln1_b", "wq", "wk", "wv", "wo", "bo",
                "ln2_g", "ln2_b", "w1", "b1", "w2", "b2")


def encoder_layer(x, p, *, heads, dim_head, block_b=1):
    B, N, D = x.shape
    assert B % block_b == 0, "batch must be divisible by block_b"
    Bb = block_b
    E = heads * dim_head
    H = p["w1"].shape[1]
    kernel = functools.partial(encoder_layer_kernel, heads=heads, dim_head=dim_head)

    def full(shape):
        n = len(shape)
        return pl.BlockSpec(shape, lambda b, n=n: (0,) * n)

    in_specs = [pl.BlockSpec((Bb, N, D), lambda b: (b, 0, 0))]
    in_specs += [full(p[k].shape) for k in _PARAM_ORDER]

    # Advisory cost estimate so XLA can schedule neighbouring layers' HBM traffic.
    flops = int(2 * B * N * D * 3 * E          # QKV projections
                + 4 * B * heads * N * N * dim_head   # scores + PV
                + 2 * B * N * E * D            # output projection
                + 4 * B * N * D * H)           # FFN
    transcendentals = int(B * heads * N * N + B * N * H)
    bytes_accessed = int(2 * x.size * x.dtype.itemsize
                         + sum(int(p[k].size) * p[k].dtype.itemsize for k in _PARAM_ORDER))

    return pl.pallas_call(
        kernel,
        out_shape=jax.ShapeDtypeStruct((B, N, D), x.dtype),
        grid=(B // Bb,),
        in_specs=in_specs,
        out_specs=pl.BlockSpec((Bb, N, D), lambda b: (b, 0, 0)),
        compiler_params=pltpu.CompilerParams(
            dimension_semantics=("parallel",),
            vmem_limit_bytes=64 * 1024 * 1024),
        cost_estimate=pl.CostEstimate(flops=flops,
                                      transcendentals=transcendentals,
                                      bytes_accessed=bytes_accessed),
    )(x, *[p[k] for k in _PARAM_ORDER])


def init_layer_params(key, dim, heads, dim_head, mlp_dim):
    ks = jax.random.split(key, 8)
    s = 0.02

    def w(k, shape):  # bf16 MXU operands (f32 accumulation in-kernel)
        return (s * jax.random.normal(k, shape, jnp.float32)).astype(jnp.bfloat16)

    return {
        # LayerNorm / bias params stay f32 (elementwise math runs in f32).
        "ln1_g": jnp.ones((1, dim), jnp.float32),
        "ln1_b": jnp.zeros((1, dim), jnp.float32),
        # to_qkv (bias=False) stored head-major: (heads, dim, dim_head).
        # (Porting a PyTorch (3E, dim) to_qkv weight: wq[h] = W[:E][h*d:(h+1)*d, :].T, etc.)
        "wq": w(ks[0], (heads, dim, dim_head)),
        "wk": w(ks[1], (heads, dim, dim_head)),
        "wv": w(ks[2], (heads, dim, dim_head)),
        # to_out Linear(E, dim) stored per-head: (heads, dim_head, dim).
        "wo": w(ks[3], (heads, dim_head, dim)),
        "bo": (s * jax.random.normal(ks[4], (1, dim), jnp.float32)),
        "ln2_g": jnp.ones((1, dim), jnp.float32),
        "ln2_b": jnp.zeros((1, dim), jnp.float32),
        "w1": w(ks[5], (dim, mlp_dim)),
        "b1": (s * jax.random.normal(ks[6], (1, mlp_dim), jnp.float32)),
        "w2": w(ks[7], (mlp_dim, dim)),
        "b2": jnp.zeros((1, dim), jnp.float32),
    }


def transformer_encoder_block(x, layer_params, *, heads, dim_head, block_b=1):
    # forward(): for attn, ffn in blocks: x = attn(x) + x ; x = ffn(x) + x
    # (the outer self.norm is defined but never applied in forward — omitted.)
    for p in layer_params:
        x = encoder_layer(x, p, heads=heads, dim_head=dim_head, block_b=block_b)
    return x


if __name__ == "__main__":
    # Small config: dim=32, depth=2, heads=4, dim_head=8, mlp_dim=64
    B, N, dim = 2, 8, 32
    depth, heads, dim_head, mlp_dim = 2, 4, 8, 64

    key = jax.random.PRNGKey(0)
    kx, kp = jax.random.split(key)
    x = jax.random.normal(kx, (B, N, dim), jnp.float32)
    layer_keys = jax.random.split(kp, depth)
    layer_params = [init_layer_params(k, dim, heads, dim_head, mlp_dim) for k in layer_keys]

    out = transformer_encoder_block(x, layer_params, heads=heads, dim_head=dim_head,
                                    block_b=1)  # grid=(2,): two parallel blocks (v7x 2 TCs)
    out = jax.block_until_ready(out)
    assert out.shape == (B, N, dim) and out.dtype == jnp.float32
    print("KERNEL_OK")
</pallas_src>

<mosaic_0001>
module attributes {stable_mosaic.version = 11 : i64} {
  func.func @encoder_layer_kernel(%arg0: i32, %arg1: memref<1x8x32xf32, #tpu.memory_space<vmem>>, %arg2: memref<1x32xf32, #tpu.memory_space<vmem>>, %arg3: memref<1x32xf32, #tpu.memory_space<vmem>>, %arg4: memref<4x32x8xbf16, #tpu.memory_space<vmem>>, %arg5: memref<4x32x8xbf16, #tpu.memory_space<vmem>>, %arg6: memref<4x32x8xbf16, #tpu.memory_space<vmem>>, %arg7: memref<4x8x32xbf16, #tpu.memory_space<vmem>>, %arg8: memref<1x32xf32, #tpu.memory_space<vmem>>, %arg9: memref<1x32xf32, #tpu.memory_space<vmem>>, %arg10: memref<1x32xf32, #tpu.memory_space<vmem>>, %arg11: memref<32x64xbf16, #tpu.memory_space<vmem>>, %arg12: memref<1x64xf32, #tpu.memory_space<vmem>>, %arg13: memref<64x32xbf16, #tpu.memory_space<vmem>>, %arg14: memref<1x32xf32, #tpu.memory_space<vmem>>, %arg15: memref<1x8x32xf32, #tpu.memory_space<vmem>>) attributes {dimension_semantics = [#tpu.dimension_semantics<parallel>], iteration_bounds = array<i64: 2>, scalar_prefetch = 0 : i64, scratch_operands = 0 : i64, tpu.core_type = #tpu.core_type<tc>, window_params = [{transform_indices = @transform_0, window_bounds = array<i64: 1, 8, 32>}, {pipeline_mode = #tpu.pipeline_mode<synchronous>, transform_indices = @transform_1, window_bounds = array<i64: 1, 32>}, {pipeline_mode = #tpu.pipeline_mode<synchronous>, transform_indices = @transform_2, window_bounds = array<i64: 1, 32>}, {pipeline_mode = #tpu.pipeline_mode<synchronous>, transform_indices = @transform_3, window_bounds = array<i64: 4, 32, 8>}, {pipeline_mode = #tpu.pipeline_mode<synchronous>, transform_indices = @transform_4, window_bounds = array<i64: 4, 32, 8>}, {pipeline_mode = #tpu.pipeline_mode<synchronous>, transform_indices = @transform_5, window_bounds = array<i64: 4, 32, 8>}, {pipeline_mode = #tpu.pipeline_mode<synchronous>, transform_indices = @transform_6, window_bounds = array<i64: 4, 8, 32>}, {pipeline_mode = #tpu.pipeline_mode<synchronous>, transform_indices = @transform_7, window_bounds = array<i64: 1, 32>}, {pipeline_mode = #tpu.pipeline_mode<synchronous>, transform_indices = @transform_8, window_bounds = array<i64: 1, 32>}, {pipeline_mode = #tpu.pipeline_mode<synchronous>, transform_indices = @transform_9, window_bounds = array<i64: 1, 32>}, {pipeline_mode = #tpu.pipeline_mode<synchronous>, transform_indices = @transform_10, window_bounds = array<i64: 32, 64>}, {pipeline_mode = #tpu.pipeline_mode<synchronous>, transform_indices = @transform_11, window_bounds = array<i64: 1, 64>}, {pipeline_mode = #tpu.pipeline_mode<synchronous>, transform_indices = @transform_12, window_bounds = array<i64: 64, 32>}, {pipeline_mode = #tpu.pipeline_mode<synchronous>, transform_indices = @transform_13, window_bounds = array<i64: 1, 32>}, {transform_indices = @transform_14, window_bounds = array<i64: 1, 8, 32>}]} {
    %c0 = arith.constant 0 : index
    %c0_0 = arith.constant 0 : index
    %c0_1 = arith.constant 0 : index
    %0 = vector.load %arg1[%c0, %c0_0, %c0_1] : memref<1x8x32xf32, #tpu.memory_space<vmem>>, vector<1x8x32xf32>
    %1 = vector.shape_cast %0 : vector<1x8x32xf32> to vector<8x32xf32>
    %c0_2 = arith.constant 0 : index
    %c0_3 = arith.constant 0 : index
    %2 = vector.load %arg2[%c0_2, %c0_3] : memref<1x32xf32, #tpu.memory_space<vmem>>, vector<1x32xf32>
    %c0_4 = arith.constant 0 : index
    %c0_5 = arith.constant 0 : index
    %3 = vector.load %arg3[%c0_4, %c0_5] : memref<1x32xf32, #tpu.memory_space<vmem>>, vector<1x32xf32>
    %cst = arith.constant dense<0.000000e+00> : vector<8xf32>
    %4 = vector.multi_reduction <add>, %1, %cst [1] : vector<8x32xf32> to vector<8xf32>
    %5 = vector.shape_cast %4 : vector<8xf32> to vector<8x1xf32>
    %cst_6 = arith.constant 3.200000e+01 : f32
    %6 = vector.broadcast %cst_6 : f32 to vector<8x1xf32>
    %7 = arith.divf %5, %6 : vector<8x1xf32>
    %8 = vector.broadcast %7 : vector<8x1xf32> to vector<8x32xf32>
    %9 = arith.subf %1, %8 : vector<8x32xf32>
    %10 = arith.mulf %9, %9 : vector<8x32xf32>
    %cst_7 = arith.constant dense<0.000000e+00> : vector<8xf32>
    %11 = vector.multi_reduction <add>, %10, %cst_7 [1] : vector<8x32xf32> to vector<8xf32>
    %12 = vector.shape_cast %11 : vector<8xf32> to vector<8x1xf32>
    %cst_8 = arith.constant 3.200000e+01 : f32
    %13 = vector.broadcast %cst_8 : f32 to vector<8x1xf32>
    %14 = arith.divf %12, %13 : vector<8x1xf32>
    %15 = vector.broadcast %7 : vector<8x1xf32> to vector<8x32xf32>
    %16 = arith.subf %1, %15 : vector<8x32xf32>
    %cst_9 = arith.constant 9.99999974E-6 : f32
    %17 = vector.broadcast %cst_9 : f32 to vector<8x1xf32>
    %18 = arith.addf %14, %17 : vector<8x1xf32>
    %19 = math.rsqrt %18 : vector<8x1xf32>
    %20 = vector.broadcast %19 : vector<8x1xf32> to vector<8x32xf32>
    %21 = arith.mulf %16, %20 : vector<8x32xf32>
    %22 = vector.broadcast %2 : vector<1x32xf32> to vector<8x32xf32>
    %23 = arith.mulf %21, %22 : vector<8x32xf32>
    %24 = vector.broadcast %3 : vector<1x32xf32> to vector<8x32xf32>
    %25 = arith.addf %23, %24 : vector<8x32xf32>
    %26 = vector.shape_cast %25 : vector<8x32xf32> to vector<1x1x8x32xf32>
    %27 = vector.shape_cast %26 : vector<1x1x8x32xf32> to vector<1x1x8x32xf32>
    %28 = vector.broadcast %27 : vector<1x1x8x32xf32> to vector<1x4x8x32xf32>
    %29 = vector.shape_cast %28 : vector<1x4x8x32xf32> to vector<4x8x32xf32>
    %30 = arith.truncf %29 : vector<4x8x32xf32> to vector<4x8x32xbf16>
    %c0_10 = arith.constant 0 : index
    %c0_11 = arith.constant 0 : index
    %c0_12 = arith.constant 0 : index
    %31 = vector.load %arg4[%c0_10, %c0_11, %c0_12] : memref<4x32x8xbf16, #tpu.memory_space<vmem>>, vector<4x32x8xbf16>
    %c0_13 = arith.constant 0 : index
    %c0_14 = arith.constant 0 : index
    %c0_15 = arith.constant 0 : index
    %32 = vector.load %arg5[%c0_13, %c0_14, %c0_15] : memref<4x32x8xbf16, #tpu.memory_space<vmem>>, vector<4x32x8xbf16>
    %c0_16 = arith.constant 0 : index
    %c0_17 = arith.constant 0 : index
    %c0_18 = arith.constant 0 : index
    %33 = vector.load %arg6[%c0_16, %c0_17, %c0_18] : memref<4x32x8xbf16, #tpu.memory_space<vmem>>, vector<4x32x8xbf16>
    %cst_19 = arith.constant dense<0.000000e+00> : vector<4x8x8xf32>
    %34 = tpu.matmul %30, %31, %cst_19 {dimension_numbers = #tpu.dot_dimension_numbers<[2], [1], [1], [2], [0, 0, 0, 1, 1, 2], [0], [0]>} : vector<4x8x32xbf16>, vector<4x32x8xbf16>, vector<4x8x8xf32> -> vector<4x8x8xf32>
    %cst_20 = arith.constant dense<0.000000e+00> : vector<4x8x8xf32>
    %35 = tpu.matmul %30, %32, %cst_20 {dimension_numbers = #tpu.dot_dimension_numbers<[2], [1], [1], [2], [0, 0, 0, 1, 1, 2], [0], [0]>} : vector<4x8x32xbf16>, vector<4x32x8xbf16>, vector<4x8x8xf32> -> vector<4x8x8xf32>
    %cst_21 = arith.constant dense<0.000000e+00> : vector<4x8x8xf32>
    %36 = tpu.matmul %30, %33, %cst_21 {dimension_numbers = #tpu.dot_dimension_numbers<[2], [1], [1], [2], [0, 0, 0, 1, 1, 2], [0], [0]>} : vector<4x8x32xbf16>, vector<4x32x8xbf16>, vector<4x8x8xf32> -> vector<4x8x8xf32>
    %cst_22 = arith.constant 0.353553385 : f32
    %37 = vector.broadcast %cst_22 : f32 to vector<4x8x8xf32>
    %38 = arith.mulf %34, %37 : vector<4x8x8xf32>
    %39 = arith.truncf %38 : vector<4x8x8xf32> to vector<4x8x8xbf16>
    %40 = arith.truncf %35 : vector<4x8x8xf32> to vector<4x8x8xbf16>
    %41 = arith.truncf %36 : vector<4x8x8xf32> to vector<4x8x8xbf16>
    %cst_23 = arith.constant dense<0.000000e+00> : vector<4x8x8xf32>
    %42 = tpu.matmul %39, %40, %cst_23 {dimension_numbers = #tpu.dot_dimension_numbers<[2], [2], [1], [1], [0, 0, 0, 1, 1, 1], [0], [0]>} : vector<4x8x8xbf16>, vector<4x8x8xbf16>, vector<4x8x8xf32> -> vector<4x8x8xf32>
    %cst_24 = arith.constant dense<0xFF800000> : vector<4x8xf32>
    %43 = vector.multi_reduction <maximumf>, %42, %cst_24 [2] : vector<4x8x8xf32> to vector<4x8xf32>
    %44 = vector.shape_cast %43 : vector<4x8xf32> to vector<4x8x1xf32>
    %45 = vector.broadcast %44 : vector<4x8x1xf32> to vector<4x8x8xf32>
    %46 = arith.subf %42, %45 : vector<4x8x8xf32>
    %47 = math.exp %46 : vector<4x8x8xf32>
    %cst_25 = arith.constant dense<0.000000e+00> : vector<4x8xf32>
    %48 = vector.multi_reduction <add>, %47, %cst_25 [2] : vector<4x8x8xf32> to vector<4x8xf32>
    %49 = vector.shape_cast %48 : vector<4x8xf32> to vector<4x8x1xf32>
    %50 = arith.truncf %47 : vector<4x8x8xf32> to vector<4x8x8xbf16>
    %cst_26 = arith.constant dense<0.000000e+00> : vector<4x8x8xf32>
    %51 = tpu.matmul %50, %41, %cst_26 {dimension_numbers = #tpu.dot_dimension_numbers<[2], [1], [1], [2], [0, 0, 0, 1, 1, 2], [0], [0]>} : vector<4x8x8xbf16>, vector<4x8x8xbf16>, vector<4x8x8xf32> -> vector<4x8x8xf32>
    %52 = tpu.reciprocal %49 {approx = true} : vector<4x8x1xf32> -> vector<4x8x1xf32>
    %53 = vector.broadcast %52 : vector<4x8x1xf32> to vector<4x8x8xf32>
    %54 = arith.mulf %51, %53 : vector<4x8x8xf32>
    %c0_27 = arith.constant 0 : index
    %c0_28 = arith.constant 0 : index
    %c0_29 = arith.constant 0 : index
    %55 = vector.load %arg7[%c0_27, %c0_28, %c0_29] : memref<4x8x32xbf16, #tpu.memory_space<vmem>>, vector<4x8x32xbf16>
    %56 = arith.truncf %54 : vector<4x8x8xf32> to vector<4x8x8xbf16>
    %cst_30 = arith.constant dense<0.000000e+00> : vector<4x8x32xf32>
    %57 = tpu.matmul %56, %55, %cst_30 {dimension_numbers = #tpu.dot_dimension_numbers<[2], [1], [1], [2], [0, 0, 0, 1, 1, 2], [0], [0]>} : vector<4x8x8xbf16>, vector<4x8x32xbf16>, vector<4x8x32xf32> -> vector<4x8x32xf32>
    %58 = vector.shape_cast %57 : vector<4x8x32xf32> to vector<1x4x8x32xf32>
    %cst_31 = arith.constant dense<0.000000e+00> : vector<1x8x32xf32>
    %59 = vector.multi_reduction <add>, %58, %cst_31 [1] : vector<1x4x8x32xf32> to vector<1x8x32xf32>
    %60 = arith.addf %0, %59 : vector<1x8x32xf32>
    %c0_32 = arith.constant 0 : index
    %c0_33 = arith.constant 0 : index
    %61 = vector.load %arg8[%c0_32, %c0_33] : memref<1x32xf32, #tpu.memory_space<vmem>>, vector<1x32xf32>
    %62 = vector.shape_cast %61 : vector<1x32xf32> to vector<1x1x32xf32>
    %63 = vector.broadcast %62 : vector<1x1x32xf32> to vector<1x8x32xf32>
    %64 = arith.addf %60, %63 : vector<1x8x32xf32>
    %65 = vector.shape_cast %64 : vector<1x8x32xf32> to vector<8x32xf32>
    %c0_34 = arith.constant 0 : index
    %c0_35 = arith.constant 0 : index
    %66 = vector.load %arg9[%c0_34, %c0_35] : memref<1x32xf32, #tpu.memory_space<vmem>>, vector<1x32xf32>
    %c0_36 = arith.constant 0 : index
    %c0_37 = arith.constant 0 : index
    %67 = vector.load %arg10[%c0_36, %c0_37] : memref<1x32xf32, #tpu.memory_space<vmem>>, vector<1x32xf32>
    %cst_38 = arith.constant dense<0.000000e+00> : vector<8xf32>
    %68 = vector.multi_reduction <add>, %65, %cst_38 [1] : vector<8x32xf32> to vector<8xf32>
    %69 = vector.shape_cast %68 : vector<8xf32> to vector<8x1xf32>
    %cst_39 = arith.constant 3.200000e+01 : f32
    %70 = vector.broadcast %cst_39 : f32 to vector<8x1xf32>
    %71 = arith.divf %69, %70 : vector<8x1xf32>
    %72 = vector.broadcast %71 : vector<8x1xf32> to vector<8x32xf32>
    %73 = arith.subf %65, %72 : vector<8x32xf32>
    %74 = arith.mulf %73, %73 : vector<8x32xf32>
    %cst_40 = arith.constant dense<0.000000e+00> : vector<8xf32>
    %75 = vector.multi_reduction <add>, %74, %cst_40 [1] : vector<8x32xf32> to vector<8xf32>
    %76 = vector.shape_cast %75 : vector<8xf32> to vector<8x1xf32>
    %cst_41 = arith.constant 3.200000e+01 : f32
    %77 = vector.broadcast %cst_41 : f32 to vector<8x1xf32>
    %78 = arith.divf %76, %77 : vector<8x1xf32>
    %79 = vector.broadcast %71 : vector<8x1xf32> to vector<8x32xf32>
    %80 = arith.subf %65, %79 : vector<8x32xf32>
    %cst_42 = arith.constant 9.99999974E-6 : f32
    %81 = vector.broadcast %cst_42 : f32 to vector<8x1xf32>
    %82 = arith.addf %78, %81 : vector<8x1xf32>
    %83 = math.rsqrt %82 : vector<8x1xf32>
    %84 = vector.broadcast %83 : vector<8x1xf32> to vector<8x32xf32>
    %85 = arith.mulf %80, %84 : vector<8x32xf32>
    %86 = vector.broadcast %66 : vector<1x32xf32> to vector<8x32xf32>
    %87 = arith.mulf %85, %86 : vector<8x32xf32>
    %88 = vector.broadcast %67 : vector<1x32xf32> to vector<8x32xf32>
    %89 = arith.addf %87, %88 : vector<8x32xf32>
    %90 = arith.truncf %89 : vector<8x32xf32> to vector<8x32xbf16>
    %c0_43 = arith.constant 0 : index
    %c0_44 = arith.constant 0 : index
    %91 = vector.load %arg11[%c0_43, %c0_44] : memref<32x64xbf16, #tpu.memory_space<vmem>>, vector<32x64xbf16>
    %cst_45 = arith.constant dense<0.000000e+00> : vector<8x64xf32>
    %92 = tpu.matmul %90, %91, %cst_45 {dimension_numbers = #tpu.dot_dimension_numbers<[1], [0], [0], [1], [0, 0, 1, 1], [], []>} : vector<8x32xbf16>, vector<32x64xbf16>, vector<8x64xf32> -> vector<8x64xf32>
    %c0_46 = arith.constant 0 : index
    %c0_47 = arith.constant 0 : index
    %93 = vector.load %arg12[%c0_46, %c0_47] : memref<1x64xf32, #tpu.memory_space<vmem>>, vector<1x64xf32>
    %94 = vector.broadcast %93 : vector<1x64xf32> to vector<8x64xf32>
    %95 = arith.addf %92, %94 : vector<8x64xf32>
    %cst_48 = arith.constant 5.000000e-01 : f32
    %96 = vector.broadcast %cst_48 : f32 to vector<8x64xf32>
    %97 = arith.mulf %96, %95 : vector<8x64xf32>
    %cst_49 = arith.constant 0.707106769 : f32
    %98 = vector.broadcast %cst_49 : f32 to vector<8x64xf32>
    %99 = arith.mulf %95, %98 : vector<8x64xf32>
    %100 = math.erf %99 : vector<8x64xf32>
    %cst_50 = arith.constant 1.000000e+00 : f32
    %101 = vector.broadcast %cst_50 : f32 to vector<8x64xf32>
    %102 = arith.addf %101, %100 : vector<8x64xf32>
    %103 = arith.mulf %97, %102 : vector<8x64xf32>
    %104 = arith.truncf %103 : vector<8x64xf32> to vector<8x64xbf16>
    %c0_51 = arith.constant 0 : index
    %c0_52 = arith.constant 0 : index
    %105 = vector.load %arg13[%c0_51, %c0_52] : memref<64x32xbf16, #tpu.memory_space<vmem>>, vector<64x32xbf16>
    %cst_53 = arith.constant dense<0.000000e+00> : vector<8x32xf32>
    %106 = tpu.matmul %104, %105, %cst_53 {dimension_numbers = #tpu.dot_dimension_numbers<[1], [0], [0], [1], [0, 0, 1, 1], [], []>} : vector<8x64xbf16>, vector<64x32xbf16>, vector<8x32xf32> -> vector<8x32xf32>
    %c0_54 = arith.constant 0 : index
    %c0_55 = arith.constant 0 : index
    %107 = vector.load %arg14[%c0_54, %c0_55] : memref<1x32xf32, #tpu.memory_space<vmem>>, vector<1x32xf32>
    %108 = vector.broadcast %107 : vector<1x32xf32> to vector<8x32xf32>
    %109 = arith.addf %106, %108 : vector<8x32xf32>
    %110 = vector.shape_cast %109 : vector<8x32xf32> to vector<1x8x32xf32>
    %111 = arith.addf %64, %110 : vector<1x8x32xf32>
    %c0_56 = arith.constant 0 : index
    %c0_57 = arith.constant 0 : index
    %c0_58 = arith.constant 0 : index
    %112 = vector.load %arg15[%c0_56, %c0_57, %c0_58] : memref<1x8x32xf32, #tpu.memory_space<vmem>>, vector<1x8x32xf32>
    tpu.vector_store %arg15[%c0_56, %c0_57, %c0_58], %111 {strides = array<i32>} : memref<1x8x32xf32, #tpu.memory_space<vmem>>, vector<1x8x32xf32>,
    return
  }
  func.func @transform_0(%arg0: i32) -> (i32, i32, i32) {
    %c0_i32 = arith.constant 0 : i32
    %c0_i32_0 = arith.constant 0 : i32
    %c0_i32_1 = arith.constant 0 : i32
    return %arg0, %c0_i32, %c0_i32_0 : i32, i32, i32
  }
  func.func @transform_1(%arg0: i32) -> (i32, i32) {
    %c0_i32 = arith.constant 0 : i32
    %c0_i32_0 = arith.constant 0 : i32
    %c0_i32_1 = arith.constant 0 : i32
    return %c0_i32, %c0_i32_0 : i32, i32
  }
  func.func @transform_2(%arg0: i32) -> (i32, i32) {
    %c0_i32 = arith.constant 0 : i32
    %c0_i32_0 = arith.constant 0 : i32
    %c0_i32_1 = arith.constant 0 : i32
    return %c0_i32, %c0_i32_0 : i32, i32
  }
  func.func @transform_3(%arg0: i32) -> (i32, i32, i32) {
    %c0_i32 = arith.constant 0 : i32
    %c0_i32_0 = arith.constant 0 : i32
    %c0_i32_1 = arith.constant 0 : i32
    %c0_i32_2 = arith.constant 0 : i32
    return %c0_i32, %c0_i32_0, %c0_i32_1 : i32, i32, i32
  }
  func.func @transform_4(%arg0: i32) -> (i32, i32, i32) {
    %c0_i32 = arith.constant 0 : i32
    %c0_i32_0 = arith.constant 0 : i32
    %c0_i32_1 = arith.constant 0 : i32
    %c0_i32_2 = arith.constant 0 : i32
    return %c0_i32, %c0_i32_0, %c0_i32_1 : i32, i32, i32
  }
  func.func @transform_5(%arg0: i32) -> (i32, i32, i32) {
    %c0_i32 = arith.constant 0 : i32
    %c0_i32_0 = arith.constant 0 : i32
    %c0_i32_1 = arith.constant 0 : i32
    %c0_i32_2 = arith.constant 0 : i32
    return %c0_i32, %c0_i32_0, %c0_i32_1 : i32, i32, i32
  }
  func.func @transform_6(%arg0: i32) -> (i32, i32, i32) {
    %c0_i32 = arith.constant 0 : i32
    %c0_i32_0 = arith.constant 0 : i32
    %c0_i32_1 = arith.constant 0 : i32
    %c0_i32_2 = arith.constant 0 : i32
    return %c0_i32, %c0_i32_0, %c0_i32_1 : i32, i32, i32
  }
  func.func @transform_7(%arg0: i32) -> (i32, i32) {
    %c0_i32 = arith.constant 0 : i32
    %c0_i32_0 = arith.constant 0 : i32
    %c0_i32_1 = arith.constant 0 : i32
    return %c0_i32, %c0_i32_0 : i32, i32
  }
  func.func @transform_8(%arg0: i32) -> (i32, i32) {
    %c0_i32 = arith.constant 0 : i32
    %c0_i32_0 = arith.constant 0 : i32
    %c0_i32_1 = arith.constant 0 : i32
    return %c0_i32, %c0_i32_0 : i32, i32
  }
  func.func @transform_9(%arg0: i32) -> (i32, i32) {
    %c0_i32 = arith.constant 0 : i32
    %c0_i32_0 = arith.constant 0 : i32
    %c0_i32_1 = arith.constant 0 : i32
    return %c0_i32, %c0_i32_0 : i32, i32
  }
  func.func @transform_10(%arg0: i32) -> (i32, i32) {
    %c0_i32 = arith.constant 0 : i32
    %c0_i32_0 = arith.constant 0 : i32
    %c0_i32_1 = arith.constant 0 : i32
    return %c0_i32, %c0_i32_0 : i32, i32
  }
  func.func @transform_11(%arg0: i32) -> (i32, i32) {
    %c0_i32 = arith.constant 0 : i32
    %c0_i32_0 = arith.constant 0 : i32
    %c0_i32_1 = arith.constant 0 : i32
    return %c0_i32, %c0_i32_0 : i32, i32
  }
  func.func @transform_12(%arg0: i32) -> (i32, i32) {
    %c0_i32 = arith.constant 0 : i32
    %c0_i32_0 = arith.constant 0 : i32
    %c0_i32_1 = arith.constant 0 : i32
    return %c0_i32, %c0_i32_0 : i32, i32
  }
  func.func @transform_13(%arg0: i32) -> (i32, i32) {
    %c0_i32 = arith.constant 0 : i32
    %c0_i32_0 = arith.constant 0 : i32
    %c0_i32_1 = arith.constant 0 : i32
    return %c0_i32, %c0_i32_0 : i32, i32
  }
  func.func @transform_14(%arg0: i32) -> (i32, i32, i32) {
    %c0_i32 = arith.constant 0 : i32
    %c0_i32_0 = arith.constant 0 : i32
    %c0_i32_1 = arith.constant 0 : i32
    return %arg0, %c0_i32, %c0_i32_0 : i32, i32, i32
  }
}

</mosaic_0001>

<bundles_post_ra>
// kernel: tpu_custom_call.1
= control target key start
LH: loop header
LB: loop body
LE: loop exit
PB: predicated region body
PF: predicated region fallthrough
CT: control target
= control target key end

     0   :  { %s4228_s0 = inlined_call_operand.hbm [shape: f32[2,8,32], index: 0, kind: input, shape index: {}]   ;;  %s4229_s1 = inlined_call_operand.hbm [shape: f32[1,32], index: 1, kind: input, shape index: {}]   ;;  %s4230_s2 = inlined_call_operand.hbm [shape: f32[1,32], index: 2, kind: input, shape index: {}]   ;;  %s4231_s3 = inlined_call_operand.hbm [shape: bf16[4,32,8], index: 3, kind: input, shape index: {}]   ;;  %s4232_s4 = inlined_call_operand.hbm [shape: bf16[4,32,8], index: 4, kind: input, shape index: {}]   ;;  %s4233_s5 = inlined_call_operand.hbm [shape: bf16[4,32,8], index: 5, kind: input, shape index: {}]   ;;  %s4234_s6 = inlined_call_operand.hbm [shape: bf16[4,8,32], index: 6, kind: input, shape index: {}]   ;;  %s4235_s7 = inlined_call_operand.hbm [shape: f32[1,32], index: 7, kind: input, shape index: {}]   ;;  %s4236_s8 = inlined_call_operand.hbm [shape: f32[1,32], index: 8, kind: input, shape index: {}]   ;;  %s4237_s9 = inlined_call_operand.hbm [shape: f32[1,32], index: 9, kind: input, shape index: {}]   ;;  %s4238_s10 = inlined_call_operand.hbm [shape: bf16[32,64], index: 10, kind: input, shape index: {}]   ;;  %s4239_s11 = inlined_call_operand.hbm [shape: f32[1,64], index: 11, kind: input, shape index: {}]   ;;  %s4240_s12 = inlined_call_operand.hbm [shape: bf16[64,32], index: 12, kind: input, shape index: {}]   ;;  %s4241_s13 = inlined_call_operand.hbm [shape: f32[1,32], index: 13, kind: input, shape index: {}]   ;;  %s4242_s14 = inlined_call_operand.hbm [shape: f32[2,8,32], index: 14, kind: output, shape index: {}]  }
   0x1   :  { %4252 = sst [smem:[#allocation38_spill]] %s4228_s0 }
   0x2   :  { %4253 = sst [smem:[#allocation39_spill]] %s4229_s1 }
   0x3   :  { %4254 = sst [smem:[#allocation40_spill]] %s4230_s2 }
   0x4   :  { %4255 = sst [smem:[#allocation41_spill]] %s4231_s3 }
   0x5   :  { %4256 = sst [smem:[#allocation42_spill]] %s4242_s14 }
   0x6   :  { %19 = vsyncpa [#allocation3], 0 }
   0x7   :  { %21 = vsyncpa [#allocation3 + $0x1], 0 }
   0x8   :  { %22 = vsyncpa [#allocation6], 0 }
   0x9   :  { %23 = vsyncpa [#allocation9], 0 }
   0xa   :  { %24 = vsyncpa [#allocation12], 0 }
   0xb   :  { %25 = vsyncpa [#allocation15], 0 }
   0xc   :  { %26 = vsyncpa [#allocation18], 0 }
   0xd   :  { %27 = vsyncpa [#allocation21], 0 }
   0xe   :  { %28 = vsyncpa [#allocation24], 0 }
   0xf   :  { %29 = vsyncpa [#allocation4], 0 }
  0x10   :  { %31 = vsyncpa [#allocation4 + $0x1], 0  ;;  %s3578_s29 = smov 0   ;;  %s3580_s30 = smov 0  }
  0x11   :  { %s3582_s15 = smov 0   ;;  %s3584_s16 = smov 0  }
  0x12 LB: > { %4257 = sst [smem:[#allocation35_spill]] %s3470_s29  ;;  %s3484_s17 = smov [#allocation5]   ;;  %s3482_s16 = sphi %s3584_s16, %s4299_s16   ;;  %s3478_s15 = sphi %s3582_s15, %s4298_s15   ;;  %s3474_s30 = sphi %s3580_s30, %s4297_s30   ;;  %s3470_s29 = sphi %s3578_s29, %s4296_s29  }
  0x13   : > { %s380_s18 = sshll.u32 %s3484_s17, 4  ;;  %s3599_s19 = sadd.s32 4294967295, %s3482_s16   ;;  %s3604_s18 = int_to_ptr.vmem [resolvable:$true] %s380_s18 }
  0x14   : > { %4258 = sst [smem:[#allocation36_spill]] %s3599_s19  ;;  %p2405_p0 = scmp.ge.s32.totalorder %s3482_s16, 1 }
  0x15   : > { %p4249_p1 = scmp.eq.s32.totalorder %s3599_s19, 0  ;;  %p367_p2 = scmp.lt.s32.totalorder %s3482_s16, 3 }
  0x16   : > { %s3485_s21 = smov [#allocation8]   ;;  %s3486_s24 = smov [#allocation11]  }
  0x17   : > { %p3606_p3 = pnand %p2405_p0, %p367_p2  ;;  %s401_s22 = sshll.u32 %s3485_s21, 4  ;;  %s3613_s22 = int_to_ptr.vmem [resolvable:$true] %s401_s22 }
  0x18   : > { %s427_s25 = sshll.u32 %s3486_s24, 4  ;;  %s4262_s1 = sld [smem:[#allocation39_spill]]  ;;  %s3621_s25 = int_to_ptr.vmem [resolvable:$true] %s427_s25 }
  0x19   : > { %s4259_s20 = scalar_select %p3606_p3, 1, 0 }
  0x1a   : > { %p2817_p5 = pneg %p3606_p3 }
  0x1b   : > { %4260 = sst [smem:[#allocation37_spill]] %s4259_s20 }
  0x1c   : > { %p3617_p6 = pnand %p2817_p5, %p4249_p1 }
  0x1e   : > { %s2994_s28 = scalar_lea.hbm %s4262_s1, 16  ;;  %p3631_p8 = pneg %p3617_p6 }
  0x1f   : > { %p2995_p7 = scmp.ne.s32.totalorder %s4262_s1, %s2994_s28  ;;  %p3001_p11 = scmp.lt.u32.totalorder %s2994_s28, %s4262_s1 }
  0x21   : > { %p2997_p9 = pnand %p3631_p8, %p2995_p7 }
  0x23   : > { %p2998_p10 = pneg %p2997_p9 }
  0x25   : > { %p3003_p12 = pnand %p3001_p11, %p2998_p10 }
  0x27   : > { %3006 = shalt.err (!%p3003_p12)
}
  0x28   : > { %s3007_s14 = scalar_lea.vmem %s3604_s18, 16  ;;  %s3014_s26 = scalar_lea.vmem %s3604_s18, 32 }
  0x29   : > { %p3008_p13 = scmp.ne.s32.totalorder %s3604_s18, %s3007_s14  ;;  %p3015_p5 = scmp.lt.s32.totalorder %s3604_s18, %s3604_s18 }
  0x2a   : > { %p3016_p7 = scmp.lt.s32.totalorder %s3014_s26, %s3007_s14 }
  0x2b   : > { %p3010_p0 = pnand %p3008_p13, %p3631_p8 }
  0x2c   : > { %p3017_p9 = por %p3016_p7, %p3015_p5 }
  0x2d   : > { %p3011_p2 = pneg %p3010_p0 }
  0x2f   : > { %p3018_p4 = pnand %p3017_p9, %p3011_p2 }
  0x31   : > { %3021 = shalt.err (!%p3018_p4)
}
  0x32   : > { %2820 = dma.hbm_to_vmem [thread:$0]  (!%p3617_p6), %s4262_s1, 16, %s3604_s18, [#allocation6]  }
  0x33   : > { %s4264_s3 = sld [smem:[#allocation41_spill]] }
  0x39   : > { %s3022_s24 = scalar_lea.hbm %s4264_s3, 1024 }
  0x3a   : > { %p3023_p10 = scmp.ne.s32.totalorder %s4264_s3, %s3022_s24  ;;  %p3029_p4 = scmp.lt.u32.totalorder %s3022_s24, %s4264_s3 }
  0x3c   : > { %p3025_p11 = pnand %p3023_p10, %p3631_p8 }
  0x3e   : > { %p3026_p12 = pneg %p3025_p11 }
  0x40   : > { %p3031_p13 = pnand %p3029_p4, %p3026_p12 }
  0x42   : > { %3034 = shalt.err (!%p3031_p13)
}
  0x43   : > { %s3035_s18 = scalar_lea.vmem %s3613_s22, 1024  ;;  %p3043_p7 = scmp.lt.s32.totalorder %s3613_s22, %s3613_s22 }
  0x44   : > { %p3036_p0 = scmp.ne.s32.totalorder %s3613_s22, %s3035_s18  ;;  %p3044_p9 = scmp.lt.s32.totalorder %s3035_s18, %s3035_s18 }
  0x46   : > { %p3038_p2 = pnand %p3036_p0, %p3631_p8  ;;  %p3045_p10 = por %p3044_p9, %p3043_p7 }
  0x48   : > { %p3039_p5 = pneg %p3038_p2 }
  0x4a   : > { %p3046_p11 = pnand %p3045_p10, %p3039_p5 }
  0x4c   : > { %3049 = shalt.err (!%p3046_p11)
}
  0x4d   : > { %s3487_s0 = smov 64   ;;  %s3488_s19 = smov 4  }
  0x4e   : > { %2826 = dma.hbm_to_vmem [thread:$0]  (!%p3617_p6), %s4264_s3, 1024, %s3613_s22, [#allocation9], %s3487_s0, %s3487_s0, %s3488_s19  }
  0x4f   : > { %s3050_s24 = scalar_lea.hbm %s4233_s5, 1024 }
  0x50   : > { %p3051_p12 = scmp.ne.s32.totalorder %s4233_s5, %s3050_s24  ;;  %p3057_p0 = scmp.lt.u32.totalorder %s3050_s24, %s4233_s5 }
  0x52   : > { %p3053_p4 = pnand %p3051_p12, %p3631_p8 }
  0x54   : > { %p3054_p13 = pneg %p3053_p4 }
  0x56   : > { %p3059_p2 = pnand %p3057_p0, %p3054_p13 }
  0x58   : > { %3062 = shalt.err (!%p3059_p2)
}
  0x59   : > { %s3063_s22 = scalar_lea.vmem %s3621_s25, 1024  ;;  %p3071_p10 = scmp.lt.s32.totalorder %s3621_s25, %s3621_s25 }
  0x5a   : > { %p3064_p5 = scmp.ne.s32.totalorder %s3621_s25, %s3063_s22  ;;  %p3072_p11 = scmp.lt.s32.totalorder %s3063_s22, %s3063_s22 }
  0x5c   : > { %p3066_p7 = pnand %p3064_p5, %p3631_p8  ;;  %p3073_p12 = por %p3072_p11, %p3071_p10 }
  0x5e   : > { %p3067_p9 = pneg %p3066_p7 }
  0x60   : > { %p3074_p4 = pnand %p3073_p12, %p3067_p9 }
  0x62   : > { %3077 = shalt.err (!%p3074_p4)
}
  0x63   : > { %2832 = dma.hbm_to_vmem [thread:$0]  (!%p3617_p6), %s4233_s5, 1024, %s3621_s25, [#allocation12], %s3487_s0, %s3487_s0, %s3488_s19  }
  0x64   : > { %s3489_s27 = smov [#allocation14]   ;;  %s3490_s17 = smov [#allocation17]  }
  0x65   : > { %s454_s28 = sshll.u32 %s3489_s27, 4  ;;  %s476_s24 = sshll.u32 %s3490_s17, 4  ;;  %s455_s28 = int_to_ptr.vmem [resolvable:$true] %s454_s28  ;;  %s477_s24 = int_to_ptr.vmem [resolvable:$true] %s476_s24 }
  0x66   : > { %s3078_s18 = scalar_lea.hbm %s4235_s7, 16 }
  0x67   : > { %p3079_p13 = scmp.ne.s32.totalorder %s4235_s7, %s3078_s18  ;;  %p3085_p5 = scmp.lt.u32.totalorder %s3078_s18, %s4235_s7 }
  0x69   : > { %p3081_p0 = pnand %p3079_p13, %p3631_p8 }
  0x6b   : > { %p3082_p2 = pneg %p3081_p0 }
  0x6d   : > { %p3087_p7 = pnand %p3085_p5, %p3082_p2 }
  0x6f   : > { %3090 = shalt.err (!%p3087_p7)
}
  0x70   : > { %s3091_s25 = scalar_lea.vmem %s455_s28, 16  ;;  %s3098_s20 = scalar_lea.vmem %s455_s28, 32 }
  0x71   : > { %p3092_p9 = scmp.ne.s32.totalorder %s455_s28, %s3091_s25  ;;  %p3099_p12 = scmp.lt.s32.totalorder %s455_s28, %s455_s28 }
  0x72   : > { %p3100_p4 = scmp.lt.s32.totalorder %s3098_s20, %s3091_s25 }
  0x73   : > { %p3094_p10 = pnand %p3092_p9, %p3631_p8 }
  0x74   : > { %p3101_p1 = por %p3100_p4, %p3099_p12 }
  0x75   : > { %p3095_p11 = pneg %p3094_p10 }
  0x77   : > { %p3102_p3 = pnand %p3101_p1, %p3095_p11 }
  0x79   : > { %3105 = shalt.err (!%p3102_p3)
}
  0x7a   : > { %2838 = dma.hbm_to_vmem [thread:$0]  (!%p3617_p6), %s4235_s7, 16, %s455_s28, [#allocation15]  }
  0x7b   : > { %s3106_s14 = scalar_lea.hbm %s4237_s9, 16 }
  0x7c   : > { %p3107_p13 = scmp.ne.s32.totalorder %s4237_s9, %s3106_s14  ;;  %p3113_p3 = scmp.lt.u32.totalorder %s3106_s14, %s4237_s9 }
  0x7e   : > { %p3109_p0 = pnand %p3107_p13, %p3631_p8 }
  0x80   : > { %p3110_p1 = pneg %p3109_p0 }
  0x82   : > { %p3115_p2 = pnand %p3113_p3, %p3110_p1 }
  0x84   : > { %3118 = shalt.err (!%p3115_p2)
}
  0x85   : > { %s3119_s25 = scalar_lea.vmem %s477_s24, 16  ;;  %s3126_s28 = scalar_lea.vmem %s477_s24, 32 }
  0x86   : > { %p3120_p5 = scmp.ne.s32.totalorder %s477_s24, %s3119_s25  ;;  %p3127_p10 = scmp.lt.s32.totalorder %s477_s24, %s477_s24 }
  0x87   : > { %p3128_p11 = scmp.lt.s32.totalorder %s3126_s28, %s3119_s25 }
  0x88   : > { %p3122_p7 = pnand %p3120_p5, %p3631_p8 }
  0x89   : > { %p3129_p12 = por %p3128_p11, %p3127_p10 }
  0x8a   : > { %p3123_p9 = pneg %p3122_p7 }
  0x8c   : > { %p3130_p4 = pnand %p3129_p12, %p3123_p9 }
  0x8e   : > { %3133 = shalt.err (!%p3130_p4)
}
  0x8f   : > { %2844 = dma.hbm_to_vmem [thread:$0]  (!%p3617_p6), %s4237_s9, 16, %s477_s24, [#allocation18]  }
  0x90   : > { %s3491_s27 = smov [#allocation20]   ;;  %s3492_s17 = smov [#allocation7]  }
  0x91   : > { %s500_s29 = sshll.u32 %s3491_s27, 4  ;;  %s391_s14 = sshll.u32 %s3492_s17, 4  ;;  %s501_s29 = int_to_ptr.vmem [resolvable:$true] %s500_s29  ;;  %s392_s14 = int_to_ptr.vmem [resolvable:$true] %s391_s14 }
  0x92   : > { %s3134_s22 = scalar_lea.hbm %s4239_s11, 16 }
  0x93   : > { %p3135_p13 = scmp.ne.s32.totalorder %s4239_s11, %s3134_s22  ;;  %p3141_p3 = scmp.lt.u32.totalorder %s3134_s22, %s4239_s11 }
  0x95   : > { %p3137_p0 = pnand %p3135_p13, %p3631_p8 }
  0x97   : > { %p3138_p1 = pneg %p3137_p0 }
  0x99   : > { %p3143_p2 = pnand %p3141_p3, %p3138_p1 }
  0x9b   : > { %3146 = shalt.err (!%p3143_p2)
}
  0x9c   : > { %s3147_s24 = scalar_lea.vmem %s501_s29, 16  ;;  %s3154_s3 = scalar_lea.vmem %s501_s29, 32 }
  0x9d   : > { %p3148_p5 = scmp.ne.s32.totalorder %s501_s29, %s3147_s24  ;;  %p3155_p10 = scmp.lt.s32.totalorder %s501_s29, %s501_s29 }
  0x9e   : > { %p3156_p11 = scmp.lt.s32.totalorder %s3154_s3, %s3147_s24 }
  0x9f   : > { %p3150_p7 = pnand %p3148_p5, %p3631_p8 }
  0xa0   : > { %p3157_p12 = por %p3156_p11, %p3155_p10 }
  0xa1   : > { %p3151_p9 = pneg %p3150_p7 }
  0xa3   : > { %p3158_p4 = pnand %p3157_p12, %p3151_p9 }
  0xa5   : > { %3161 = shalt.err (!%p3158_p4)
}
  0xa6   : > { %2850 = dma.hbm_to_vmem [thread:$0]  (!%p3617_p6), %s4239_s11, 16, %s501_s29, [#allocation21]  }
  0xa7   : > { %s4265_s2 = sld [smem:[#allocation40_spill]] }
  0xad   : > { %s3162_s22 = scalar_lea.hbm %s4265_s2, 16 }
  0xae   : > { %p3163_p13 = scmp.ne.s32.totalorder %s4265_s2, %s3162_s22  ;;  %p3169_p3 = scmp.lt.u32.totalorder %s3162_s22, %s4265_s2 }
  0xb0   : > { %p3165_p0 = pnand %p3163_p13, %p3631_p8 }
  0xb2   : > { %p3166_p1 = pneg %p3165_p0 }
  0xb4   : > { %p3171_p2 = pnand %p3169_p3, %p3166_p1 }
  0xb6   : > { %3174 = shalt.err (!%p3171_p2)
}
  0xb7   : > { %s3175_s24 = scalar_lea.vmem %s392_s14, 16  ;;  %s3182_s29 = scalar_lea.vmem %s392_s14, 32 }
  0xb8   : > { %p3176_p5 = scmp.ne.s32.totalorder %s392_s14, %s3175_s24  ;;  %p3183_p10 = scmp.lt.s32.totalorder %s392_s14, %s392_s14 }
  0xb9   : > { %p3184_p11 = scmp.lt.s32.totalorder %s3182_s29, %s3175_s24 }
  0xba   : > { %p3178_p7 = pnand %p3176_p5, %p3631_p8 }
  0xbb   : > { %p3185_p12 = por %p3184_p11, %p3183_p10 }
  0xbc   : > { %p3179_p9 = pneg %p3178_p7 }
  0xbe   : > { %p3186_p4 = pnand %p3185_p12, %p3179_p9 }
  0xc0   : > { %3189 = shalt.err (!%p3186_p4)
}
  0xc1   : > { %2823 = dma.hbm_to_vmem [thread:$0]  (!%p3617_p6), %s4265_s2, 16, %s392_s14, [#allocation6]  }
  0xc2   : > { %s3493_s17 = smov [#allocation10]   ;;  %s3494_s18 = smov [#allocation13]  }
  0xc3   : > { %s414_s26 = sshll.u32 %s3493_s17, 4  ;;  %s440_s22 = sshll.u32 %s3494_s18, 4  ;;  %s415_s26 = int_to_ptr.vmem [resolvable:$true] %s414_s26  ;;  %s441_s22 = int_to_ptr.vmem [resolvable:$true] %s440_s22 }
  0xc4   : > { %s3190_s28 = scalar_lea.hbm %s4232_s4, 1024 }
  0xc5   : > { %p3191_p13 = scmp.ne.s32.totalorder %s4232_s4, %s3190_s28  ;;  %p3197_p3 = scmp.lt.u32.totalorder %s3190_s28, %s4232_s4 }
  0xc7   : > { %p3193_p0 = pnand %p3191_p13, %p3631_p8 }
  0xc9   : > { %p3194_p1 = pneg %p3193_p0 }
  0xcb   : > { %p3199_p2 = pnand %p3197_p3, %p3194_p1 }
  0xcd   : > { %3202 = shalt.err (!%p3199_p2)
}
  0xce   : > { %s3203_s14 = scalar_lea.vmem %s415_s26, 1024  ;;  %p3211_p10 = scmp.lt.s32.totalorder %s415_s26, %s415_s26 }
  0xcf   : > { %p3204_p5 = scmp.ne.s32.totalorder %s415_s26, %s3203_s14  ;;  %p3212_p11 = scmp.lt.s32.totalorder %s3203_s14, %s3203_s14 }
  0xd1   : > { %p3206_p7 = pnand %p3204_p5, %p3631_p8  ;;  %p3213_p12 = por %p3212_p11, %p3211_p10 }
  0xd3   : > { %p3207_p9 = pneg %p3206_p7 }
  0xd5   : > { %p3214_p4 = pnand %p3213_p12, %p3207_p9 }
  0xd7   : > { %3217 = shalt.err (!%p3214_p4)
}
  0xd8   : > { %2829 = dma.hbm_to_vmem [thread:$0]  (!%p3617_p6), %s4232_s4, 1024, %s415_s26, [#allocation9], %s3487_s0, %s3487_s0, %s3488_s19  }
  0xd9   : > { %s3218_s25 = scalar_lea.hbm %s4234_s6, 256 }
  0xda   : > { %p3219_p13 = scmp.ne.s32.totalorder %s4234_s6, %s3218_s25  ;;  %p3225_p3 = scmp.lt.u32.totalorder %s3218_s25, %s4234_s6 }
  0xdc   : > { %p3221_p0 = pnand %p3219_p13, %p3631_p8 }
  0xde   : > { %p3222_p1 = pneg %p3221_p0 }
  0xe0   : > { %p3227_p2 = pnand %p3225_p3, %p3222_p1 }
  0xe2   : > { %3230 = shalt.err (!%p3227_p2)
}
  0xe3   : > { %s3231_s3 = scalar_lea.vmem %s441_s22, 256  ;;  %p3239_p10 = scmp.lt.s32.totalorder %s441_s22, %s441_s22 }
  0xe4   : > { %p3232_p5 = scmp.ne.s32.totalorder %s441_s22, %s3231_s3  ;;  %p3240_p11 = scmp.lt.s32.totalorder %s3231_s3, %s3231_s3 }
  0xe6   : > { %p3234_p7 = pnand %p3232_p5, %p3631_p8  ;;  %p3241_p12 = por %p3240_p11, %p3239_p10 }
  0xe8   : > { %p3235_p9 = pneg %p3234_p7 }
  0xea   : > { %p3242_p4 = pnand %p3241_p12, %p3235_p9 }
  0xec   : > { %3245 = shalt.err (!%p3242_p4)
}
  0xed   : > { %2835 = dma.hbm_to_vmem [thread:$0]  (!%p3617_p6), %s4234_s6, 256, %s441_s22, [#allocation12], %s3487_s0, %s3487_s0, %s3488_s19  }
  0xee   : > { %s3495_s27 = smov [#allocation16]   ;;  %s3496_s18 = smov [#allocation19]  }
  0xef   : > { %s465_s17 = sshll.u32 %s3495_s27, 4  ;;  %s486_s1 = sshll.u32 %s3496_s18, 4  ;;  %s466_s17 = int_to_ptr.vmem [resolvable:$true] %s465_s17  ;;  %s487_s1 = int_to_ptr.vmem [resolvable:$true] %s486_s1 }
  0xf0   : > { %s3246_s20 = scalar_lea.hbm %s4236_s8, 16 }
  0xf1   : > { %p3247_p13 = scmp.ne.s32.totalorder %s4236_s8, %s3246_s20  ;;  %p3253_p3 = scmp.lt.u32.totalorder %s3246_s20, %s4236_s8 }
  0xf3   : > { %p3249_p0 = pnand %p3247_p13, %p3631_p8 }
  0xf5   : > { %p3250_p1 = pneg %p3249_p0 }
  0xf7   : > { %p3255_p2 = pnand %p3253_p3, %p3250_p1 }
  0xf9   : > { %3258 = shalt.err (!%p3255_p2)
}
  0xfa   : > { %s3259_s22 = scalar_lea.vmem %s466_s17, 16  ;;  %s3266_s14 = scalar_lea.vmem %s466_s17, 32 }
  0xfb   : > { %p3260_p5 = scmp.ne.s32.totalorder %s466_s17, %s3259_s22  ;;  %p3267_p10 = scmp.lt.s32.totalorder %s466_s17, %s466_s17 }
  0xfc   : > { %p3268_p11 = scmp.lt.s32.totalorder %s3266_s14, %s3259_s22 }
  0xfd   : > { %p3262_p7 = pnand %p3260_p5, %p3631_p8 }
  0xfe   : > { %p3269_p12 = por %p3268_p11, %p3267_p10 }
  0xff   : > { %p3263_p9 = pneg %p3262_p7 }
 0x101   : > { %p3270_p4 = pnand %p3269_p12, %p3263_p9 }
 0x103   : > { %3273 = shalt.err (!%p3270_p4)
}
 0x104   : > { %2841 = dma.hbm_to_vmem [thread:$0]  (!%p3617_p6), %s4236_s8, 16, %s466_s17, [#allocation15]  }
 0x105   : > { %s3274_s20 = scalar_lea.hbm %s4238_s10, 256 }
 0x106   : > { %p3275_p13 = scmp.ne.s32.totalorder %s4238_s10, %s3274_s20  ;;  %p3281_p3 = scmp.lt.u32.totalorder %s3274_s20, %s4238_s10 }
 0x108   : > { %p3277_p0 = pnand %p3275_p13, %p3631_p8 }
 0x10a   : > { %p3278_p1 = pneg %p3277_p0 }
 0x10c   : > { %p3283_p2 = pnand %p3281_p3, %p3278_p1 }
 0x10e   : > { %3286 = shalt.err (!%p3283_p2)
}
 0x10f   : > { %s3287_s22 = scalar_lea.vmem %s487_s1, 256  ;;  %p3295_p10 = scmp.lt.s32.totalorder %s487_s1, %s487_s1 }
 0x110   : > { %p3288_p5 = scmp.ne.s32.totalorder %s487_s1, %s3287_s22  ;;  %p3296_p11 = scmp.lt.s32.totalorder %s3287_s22, %s3287_s22 }
 0x112   : > { %p3290_p7 = pnand %p3288_p5, %p3631_p8  ;;  %p3297_p12 = por %p3296_p11, %p3295_p10 }
 0x114   : > { %p3291_p9 = pneg %p3290_p7 }
 0x116   : > { %p3298_p4 = pnand %p3297_p12, %p3291_p9 }
 0x118   : > { %3301 = shalt.err (!%p3298_p4)
}
 0x119   : > { %2847 = dma.hbm_to_vmem [thread:$0]  (!%p3617_p6), %s4238_s10, 256, %s487_s1, [#allocation18], %s3487_s0, %s3487_s0, %s3488_s19  }
 0x11a   : > { %s3497_s27 = smov [#allocation22]   ;;  %s3498_s25 = smov [#allocation23]  }
 0x11b   : > { %s510_s18 = sshll.u32 %s3497_s27, 4  ;;  %s524_s28 = sshll.u32 %s3498_s25, 4  ;;  %s511_s18 = int_to_ptr.vmem [resolvable:$true] %s510_s18  ;;  %s525_s28 = int_to_ptr.vmem [resolvable:$true] %s524_s28 }
 0x11c   : > { %s3302_s29 = scalar_lea.hbm %s4240_s12, 512 }
 0x11d   : > { %p3303_p13 = scmp.ne.s32.totalorder %s4240_s12, %s3302_s29  ;;  %p3309_p3 = scmp.lt.u32.totalorder %s3302_s29, %s4240_s12 }
 0x11f   : > { %p3305_p0 = pnand %p3303_p13, %p3631_p8 }
 0x121   : > { %p3306_p1 = pneg %p3305_p0 }
 0x123   : > { %p3311_p2 = pnand %p3309_p3, %p3306_p1 }
 0x125   : > { %3314 = shalt.err (!%p3311_p2)
}
 0x126   : > { %s3315_s1 = scalar_lea.vmem %s511_s18, 512  ;;  %p3323_p10 = scmp.lt.s32.totalorder %s511_s18, %s511_s18 }
 0x127   : > { %p3316_p5 = scmp.ne.s32.totalorder %s511_s18, %s3315_s1  ;;  %p3324_p11 = scmp.lt.s32.totalorder %s3315_s1, %s3315_s1 }
 0x129   : > { %p3318_p7 = pnand %p3316_p5, %p3631_p8  ;;  %p3325_p12 = por %p3324_p11, %p3323_p10 }
 0x12b   : > { %p3319_p9 = pneg %p3318_p7 }
 0x12d   : > { %p3326_p4 = pnand %p3325_p12, %p3319_p9 }
 0x12f   : > { %3329 = shalt.err (!%p3326_p4)
}
 0x130   : > { %2853 = dma.hbm_to_vmem [thread:$0]  (!%p3617_p6), %s4240_s12, 512, %s511_s18, [#allocation21], %s3487_s0, %s3487_s0, %s3488_s19  }
 0x131   : > { %s3330_s24 = scalar_lea.hbm %s4241_s13, 16 }
 0x132   : > { %p3331_p13 = scmp.ne.s32.totalorder %s4241_s13, %s3330_s24  ;;  %p3337_p3 = scmp.lt.u32.totalorder %s3330_s24, %s4241_s13 }
 0x134   : > { %p3333_p0 = pnand %p3331_p13, %p3631_p8 }
 0x136   : > { %p3334_p1 = pneg %p3333_p0 }
 0x138   : > { %p3339_p2 = pnand %p3337_p3, %p3334_p1 }
 0x13a   : > { %3342 = shalt.err (!%p3339_p2)
}
 0x13b   : > { %s3343_s17 = scalar_lea.vmem %s525_s28, 16  ;;  %s3350_s0 = scalar_lea.vmem %s525_s28, 32 }
 0x13c   : > { %p3344_p5 = scmp.ne.s32.totalorder %s525_s28, %s3343_s17  ;;  %p3351_p10 = scmp.lt.s32.totalorder %s525_s28, %s525_s28 }
 0x13d   : > { %p3352_p11 = scmp.lt.s32.totalorder %s3350_s0, %s3343_s17 }
 0x13e   : > { %p3346_p7 = pnand %p3344_p5, %p3631_p8 }
 0x13f   : > { %p3353_p12 = por %p3352_p11, %p3351_p10 }
 0x140   : > { %p3347_p9 = pneg %p3346_p7 }
 0x142   : > { %p3354_p4 = pnand %p3353_p12, %p3347_p9 }
 0x144   : > { %3357 = shalt.err (!%p3354_p4)
}
 0x145   : > { %s4266_s21 = sld [smem:[#allocation35_spill]]  ;;  %s4267_s1 = sld [smem:[#allocation36_spill]] }
 0x146   : > { %2856 = dma.hbm_to_vmem [thread:$0]  (!%p3617_p6), %s4241_s13, 16, %s525_s28, [#allocation24]  }
 0x147   : > { %s2404_s14 = sadd.s32 4294967294, %s3482_s16   ;;  %s3899_s23 = sadd.s32 1, %s3482_s16  }
 0x148   : > { %s44_s27 = sadd.s32 1, %s3478_s15  ;;  %s41_s25 = ssub.s32 %s3482_s16, %s3899_s23 }
 0x149   : > { %p51_p8 = scmp.ne.s32.totalorder %s3478_s15, %s3474_s30  ;;  %p42_p13 = scmp.eq.s32.totalorder %s41_s25, 0 }
 0x14a   : > { %p52_p0 = scmp.eq.s32.totalorder %s3482_s16, 0  ;;  %p360_p9 = scmp.eq.s32.totalorder %s2404_s14, 1 }
 0x14b   : > { %p57_p1 = scmp.ne.s32.totalorder %s3474_s30, %s4266_s21  ;;  %p354_p3 = scmp.eq.s32.totalorder %s4267_s1, 1 }
 0x14c   : > { %s3911_s20 = scalar_select %p42_p13, %s3478_s15, %s44_s27  }
 0x14d   : > { %p53_p2 = por %p52_p0, %p51_p8  ;;  %p4268_p5 = scmp.eq.s32.totalorder %s4267_s1, 0 }
 0x14e   : > { %p3919_p6 = por %p354_p3, %p51_p8  ;;  %p2878_p10 = scmp.lt.s32.totalorder %s3482_s16, 2 }
 0x14f   : > { %p3915_p7 = por %p4268_p5, %p57_p1  ;;  %s535_s29 = sand.u32 1, %s3478_s15  }
 0x150   : > { %s4270_s28 = scalar_select %p3919_p6, 1, 0 }
 0x151   : > { %p3925_p11 = por %p360_p9, %p57_p1  ;;  %s2420_s26 = sshll.u32 %s535_s29, 3 }
 0x152   : > { %s2421_s22 = sshll.u32 %s3482_s16, 7  ;;  %s4272_s19 = sld [smem:[#allocation38_spill]] }
 0x153   : > { %s4271_s3 = scalar_select %p3925_p11, 1, 0 }
 0x154   : > { %s539_s21 = scalar_lea.vmem [#allocation2], %s2420_s26  ;;  %p3935_p12 = pnand %p2878_p10, %p53_p2 }
 0x155   : > { %s546_s1 = sshll.u32 %s539_s21, 4  ;;  %s536_s27 = scalar_lea.sflag [#allocation3], %s535_s29  ;;  %s3939_s1 = int_to_ptr.vmem [resolvable:$true] %s546_s1 }
 0x156   : > { %p3360_p8 = pneg %p3935_p12 }
 0x158   : > { %s3933_s18 = scalar_lea.hbm %s4272_s19, %s2421_s22  ;;  %s3363_s17 = scalar_lea.hbm %s4272_s19, 256 }
 0x159   : > { %s3358_s25 = scalar_lea.hbm %s3933_s18, 128  ;;  %p3364_p1 = scmp.lt.u32.totalorder %s3933_s18, %s4272_s19 }
 0x15a   : > { %p3359_p4 = scmp.ne.s32.totalorder %s3933_s18, %s3358_s25  ;;  %p3365_p3 = scmp.lt.u32.totalorder %s3363_s17, %s3358_s25 }
 0x15b   : > { %p3367_p5 = scmp.lt.u32.totalorder %s3358_s25, %s3933_s18 }
 0x15c   : > { %p3361_p13 = pnand %p3360_p8, %p3359_p4  ;;  %p3366_p2 = por %p3365_p3, %p3364_p1 }
 0x15e   : > { %p3362_p0 = pneg %p3361_p13  ;;  %p3368_p9 = por %p3367_p5, %p3366_p2 }
 0x160   : > { %p3369_p10 = pnand %p3368_p9, %p3362_p0 }
 0x162   : > { %3372 = shalt.err (!%p3369_p10)
}
 0x163   : > { %s3373_s29 = scalar_lea.vmem %s3939_s1, 128  ;;  %s3499_s22 = smov [#allocation2]  }
 0x164   : > { %p3374_p4 = scmp.ne.s32.totalorder %s3939_s1, %s3373_s29  ;;  %s3378_s26 = sshll.u32 %s3499_s22, 4  ;;  %s3379_s26 = int_to_ptr.vmem [resolvable:$false] %s3378_s26 }
 0x165   : > { %s3380_s0 = scalar_lea.vmem %s3379_s26, 256  ;;  %p3381_p6 = scmp.lt.s32.totalorder %s3939_s1, %s3379_s26 }
 0x166   : > { %p3376_p13 = pnand %p3374_p4, %p3360_p8  ;;  %p3382_p1 = scmp.lt.s32.totalorder %s3380_s0, %s3373_s29 }
 0x168   : > { %p3377_p11 = pneg %p3376_p13  ;;  %p3383_p3 = por %p3382_p1, %p3381_p6 }
 0x16a   : > { %p3384_p2 = pnand %p3383_p3, %p3377_p11 }
 0x16c   : > { %3387 = shalt.err (!%p3384_p2)
}
 0x16d   : > { %2860 = dma.hbm_to_vmem [thread:$0]  (!%p3935_p12), %s3933_s18, 128, %s3939_s1, %s536_s27  }
 0x16e   : > { %s4274_s25 = sld [smem:[#allocation37_spill]] }
 0x174   : > { %p4275_p0 = scmp.ne.s32.totalorder %s4274_s25, 0 }
 0x175   : > { %s3969_s17 = sand.u32 (!%p4275_p0), 1, %s3474_s30  }
 0x176   : > { %555 = sbr.rel (%p4275_p0) target bundleno = 2560 (0xa00), region = 76  ;;  %s2423_s21 = sshll.u32 (!%p4275_p0), %s3969_s17, 3 }
 0x177   : > { %s558_s29 = scalar_lea.sflag (!%p4275_p0), [#allocation3], %s3969_s17  ;;  %s561_s22 = scalar_lea.vmem (!%p4275_p0), [#allocation2], %s2423_s21 }
 0x17d   : > { %3433 = dma.done.wait (%p3915_p7), %s558_s29, 128  }
 0x17e   : > { %3435 = vsyncadd (%p3915_p7), %s558_s29, 4294967168  ;;  %s4276_s18 = sld [smem:[#allocation36_spill]] }
 0x184   : > { %p4277_p6 = scmp.eq.s32.totalorder %s4276_s18, 0 }
 0x186   : > { %3437 = dma.done.wait (%p4277_p6), [#allocation6], 32   ;;  %p4278_p11 = pmov %p4277_p6 }
 0x187   : > { %p4279_p12 = pmov %p4277_p6 }
 0x188   : > { %3439 = vsyncadd (%p4278_p11), [#allocation6], 4294967264 }
 0x189   : > { %3441 = dma.done.wait (%p4279_p12), [#allocation9], 2048   ;;  %p4280_p8 = pmov %p4277_p6 }
 0x18a   : > { %p4281_p5 = pmov %p4277_p6 }
 0x18b   : > { %3443 = vsyncadd (%p4280_p8), [#allocation9], 4294965248 }
 0x18c   : > { %3445 = dma.done.wait (%p4281_p5), [#allocation12], 1280   ;;  %p4282_p9 = pmov %p4281_p5 }
 0x18d   : > { %p4283_p7 = pmov %p4281_p5 }
 0x18e   : > { %3447 = vsyncadd (%p4282_p9), [#allocation12], 4294966016 }
 0x18f   : > { %3449 = dma.done.wait (%p4283_p7), [#allocation15], 32   ;;  %p4284_p10 = pmov %p4281_p5 }
 0x190   : > { %p4285_p4 = pmov %p4281_p5 }
 0x191   : > { %3451 = vsyncadd (%p4284_p10), [#allocation15], 4294967264 }
 0x192   : > { %3453 = dma.done.wait (%p4285_p4), [#allocation18], 272   ;;  %p4286_p13 = pmov %p4285_p4 }
 0x193   : > { %p4287_p1 = pmov %p4285_p4 }
 0x194   : > { %3455 = vsyncadd (%p4286_p13), [#allocation18], 4294967024 }
 0x195   : > { %3457 = dma.done.wait (%p4287_p1), [#allocation21], 528   ;;  %p4288_p3 = pmov %p4287_p1 }
 0x196   : > { %p4289_p2 = pmov %p4287_p1 }
 0x197   : > { %3459 = vsyncadd (%p4288_p3), [#allocation21], 4294966768 }
 0x198   : > { %3461 = dma.done.wait (%p4289_p2), [#allocation24], 16   ;;  %p4290_p0 = pmov %p4287_p1 }
 0x199   : > { %vm662_vm0 = vcmask 261120   ;;  %v4007_v0 = vld [vmem:[%s561_s22] sm:$0xff]  ;;  %v2942_v7 = vld [vmem:[#allocation8] sm:$0xff]   ;;  %v3500_v9 = vmov 0.0   ;;  %vm3501_vm1 = vmmov 0   ;;  %vm1383_vm2 = vcmask 64512  }
 0x19a   : > { %3463 = vsyncadd (%p4290_p0), [#allocation24], 4294967280  ;;  %v663_v1 = vsel %vm662_vm0, %v4007_v0, 0.0  ;;  %v2943_v8 = vld [vmem:[#allocation8 + $0x10] sm:$0xff]   ;;  %2573 = vmatprep.subr.bf16.mxu0 %v3500_v9  ;;  %2581 = vmatprep.subr.bf16.mxu1 %v3500_v9  ;;  %v2944_v10 = vld [vmem:[#allocation8 + $0x8] sm:$0xff]   ;;  %vm1611_vm3 = vcmask 1043456  }
 0x19b   : > { %664 = vadd.xlane.f32.xlu0 %v663_v1  ;;  %2574 = vmatpush3.bf16.msra.mxu0 %v2942_v7  ;;  %v2945_v11 = vld [vmem:[#allocation8 + $0x18] sm:$0xff]   ;;  %v2946_v21 = vld [vmem:[#allocation8 + $0x20] sm:$0xff]   ;;  %v2947_v22 = vld [vmem:[#allocation8 + $0x30] sm:$0xff]   ;;  %vm2150_vm4 = vcmask 523264   ;;  %s2502_s24 = sshll.u32 %s4276_s18, 7  ;;  %s657_s1 = scalar_lea.vmem [#allocation25], %s2423_s21 }
 0x19c   : > { %2582 = vmatpush3.bf16.msra.mxu1 %v2943_v8  ;;  %2575 = vmatprep.subr.bf16.mxu0 %v3500_v9  ;;  %v2438_v16 = vld [vmem:[#allocation5] ss:$0 sm:$0xff]  ;;  %v2439_v18 = vld [vmem:[#allocation7] ss:$0 sm:$0xff]  ;;  %v2948_v24 = vld [vmem:[#allocation8 + $0x28] sm:$0xff]   ;;  %s2210_s14 = sshll.u32 %s657_s1, 4  ;;  %s4185_s14 = int_to_ptr.vmem [resolvable:$true] %s2210_s14 }
 0x19d   : > { %2583 = vmatprep.subr.bf16.mxu1 %v3500_v9  ;;  %2577 = vmatprep.mubr.msk.bf16.mxu0 %vm3501_vm1, %v3500_v9  ;;  %v2949_v25 = vld [vmem:[#allocation8 + $0x38] sm:$0xff]   ;;  %v2950_v26 = vld [vmem:[#allocation10] sm:$0xff]   ;;  %v2951_v27 = vld [vmem:[#allocation10 + $0x10] sm:$0xff]   ;;  %s4291_s0 = sld [smem:[#allocation42_spill]]  ;;  %s2197_s29 = scalar_lea.sflag [#allocation4], %s3969_s17 }
 0x19e   : > { %2585 = vmatprep.mubr.msk.bf16.mxu1 %vm3501_vm1, %v3500_v9  ;;  %v2952_v28 = vld [vmem:[#allocation10 + $0x8] sm:$0xff]   ;;  %v2953_v29 = vld [vmem:[#allocation10 + $0x18] sm:$0xff]   ;;  %v2954_v30 = vld [vmem:[#allocation10 + $0x20] sm:$0xff]   ;;  %s3388_s21 = scalar_lea.vmem %s4185_s14, 128  ;;  %p4292_p11 = scmp.ne.s32.totalorder %s4270_s28, 0 }
 0x19f   : > { %2576 = vmatpush3.bf16.msra.mxu0 %v2944_v10  ;;  %v2955_v31 = vld [vmem:[#allocation10 + $0x30] sm:$0xff]   ;;  %v2956_v32 = vld [vmem:[#allocation10 + $0x28] sm:$0xff]   ;;  %v2957_v33 = vld [vmem:[#allocation10 + $0x38] sm:$0xff]   ;;  %p3389_p6 = scmp.ne.s32.totalorder %s4185_s14, %s3388_s21  ;;  %s3502_s22 = smov [#allocation25]  }
 0x1a0   : > { %2584 = vmatpush3.bf16.msra.mxu1 %v2945_v11  ;;  %2589 = vmatprep.subr.bf16.mxu0 %v3500_v9  ;;  %v2958_v34 = vld [vmem:[#allocation11] sm:$0xff]   ;;  %v2959_v35 = vld [vmem:[#allocation11 + $0x10] sm:$0xff]   ;;  %v2960_v36 = vld [vmem:[#allocation11 + $0x8] sm:$0xff]   ;;  %s3392_s18 = sshll.u32 %s3502_s22, 4  ;;  %s3393_s18 = int_to_ptr.vmem [resolvable:$false] %s3392_s18 }
 0x1a1   : > { %2597 = vmatprep.subr.bf16.mxu1 %v3500_v9  ;;  %v2961_v37 = vld [vmem:[#allocation11 + $0x18] sm:$0xff]   ;;  %v2962_v38 = vld [vmem:[#allocation11 + $0x20] sm:$0xff]   ;;  %v2963_v39 = vld [vmem:[#allocation11 + $0x30] sm:$0xff]   ;;  %p3390_p12 = pnand %p3389_p6, %p4292_p11  ;;  %s3394_s2 = scalar_lea.vmem %s3393_s18, 256 }
 0x1a2   : > { %v2964_v40 = vld [vmem:[#allocation11 + $0x28] sm:$0xff]   ;;  %v2965_v41 = vld [vmem:[#allocation11 + $0x38] sm:$0xff]   ;;  %p3395_p5 = scmp.lt.s32.totalorder %s4185_s14, %s3393_s18  ;;  %p3396_p9 = scmp.lt.s32.totalorder %s3394_s2, %s3388_s21 }
 0x1a3   : > { %s4183_s25 = scalar_lea.hbm %s4291_s0, %s2502_s24  ;;  %p3391_p8 = pneg %p3390_p12 }
 0x1a4   : > { %p3397_p7 = por %p3396_p9, %p3395_p5 }
 0x1a6   : > { %p3398_p10 = pnand %p3397_p7, %p3391_p8 }
 0x228   : > { %v665_v2 = vpop.xlane.xlu0 %664 }
 0x229   : > { %v667_v3 = vmul.f32 0.03125, %v665_v2 }
 0x22b   : > { %v668_v4 = vsub.f32 %v4007_v0, %v667_v3 }
 0x22d   : > { %v669_v5 = vmul.f32 %v668_v4, %v668_v4 }
 0x22f   : > { %v670_v6 = vsel %vm662_vm0, %v669_v5, 0.0 }
 0x230   : > { %671 = vadd.xlane.f32.xlu0 %v670_v6 }
 0x2bd   : > { %v672_v12 = vpop.xlane.xlu0 %671 }
 0x2be   : > { %v673_v13 = vmul.f32 0.03125, %v672_v12 }
 0x2c0   : > { %v674_v14 = vadd.f32 1e-05, %v673_v13 }
 0x2c2   : > { %2972 = vrsqrt.f32 %v674_v14 }
 0x2cc   : > { %v2973_v15 = vpop.eup %2972 }
 0x2cd   : > { %v676_v17 = vmul.f32 %v2973_v15, %v668_v4 }
 0x2cf   : > { %v683_v19 = vmul.f32 %v2438_v16, %v676_v17 }
 0x2d1   : > { %v690_v20 = vadd.f32 %v2439_v18, %v683_v19 }
 0x2d3   : > { %v4023_v23 = vpack.c.bf16 %v690_v20, %v690_v20 }
 0x2d5   : > { %2578 = vmatmul.mubr.msk.bf16.vlgmr.msra.gmra.mrb[0].mxu0 %vm662_vm0, %v4023_v23  ;;  %2586 = vmatmul.mubr.msk.bf16.vlgmr.msra.gmra.mrb[0].mxu1 %vm662_vm0, %v4023_v23 }
 0x2d6   : > { %2590 = vmatpush3.bf16.msra.mxu0 %v2946_v21  ;;  %2598 = vmatpush3.bf16.msra.mxu1 %v2947_v22 }
 0x2d7   : > { %2591 = vmatprep.subr.bf16.mxu0 %v3500_v9  ;;  %2599 = vmatprep.subr.bf16.mxu1 %v3500_v9 }
 0x2d8   : > { %2593 = vmatprep.mubr.msk.bf16.mxu0 %vm3501_vm1, %v3500_v9  ;;  %2601 = vmatprep.mubr.msk.bf16.mxu1 %vm3501_vm1, %v3500_v9 }
 0x2da   : > { %2592 = vmatpush3.bf16.msra.mxu0 %v2948_v24  ;;  %2600 = vmatpush3.bf16.msra.mxu1 %v2949_v25 }
 0x2db   : > { %2605 = vmatprep.subr.bf16.mxu0 %v3500_v9  ;;  %2613 = vmatprep.subr.bf16.mxu1 %v3500_v9 }
 0x2dd   : > { %2594 = vmatmul.mubr.msk.bf16.vlgmr.msra.gmra.mrb[4].mxu0 %vm662_vm0, %v4023_v23  ;;  %2602 = vmatmul.mubr.msk.bf16.vlgmr.msra.gmra.mrb[4].mxu1 %vm662_vm0, %v4023_v23 }
 0x2de   : > { %2606 = vmatpush3.bf16.msra.mxu0 %v2950_v26  ;;  %2614 = vmatpush3.bf16.msra.mxu1 %v2951_v27 }
 0x2df   : > { %2607 = vmatprep.subr.bf16.mxu0 %v3500_v9  ;;  %2615 = vmatprep.subr.bf16.mxu1 %v3500_v9 }
 0x2e0   : > { %2609 = vmatprep.mubr.msk.bf16.mxu0 %vm3501_vm1, %v3500_v9  ;;  %2617 = vmatprep.mubr.msk.bf16.mxu1 %vm3501_vm1, %v3500_v9 }
 0x2e2   : > { %2608 = vmatpush3.bf16.msra.mxu0 %v2952_v28  ;;  %2616 = vmatpush3.bf16.msra.mxu1 %v2953_v29 }
 0x2e3   : > { %2621 = vmatprep.subr.bf16.mxu0 %v3500_v9  ;;  %2629 = vmatprep.subr.bf16.mxu1 %v3500_v9 }
 0x2e5   : > { %2610 = vmatmul.mubr.msk.bf16.vlgmr.msra.gmra.mrb[8].mxu0 %vm662_vm0, %v4023_v23  ;;  %2618 = vmatmul.mubr.msk.bf16.vlgmr.msra.gmra.mrb[8].mxu1 %vm662_vm0, %v4023_v23 }
 0x2e6   : > { %2622 = vmatpush3.bf16.msra.mxu0 %v2954_v30  ;;  %2630 = vmatpush3.bf16.msra.mxu1 %v2955_v31 }
 0x2e7   : > { %2623 = vmatprep.subr.bf16.mxu0 %v3500_v9  ;;  %2631 = vmatprep.subr.bf16.mxu1 %v3500_v9 }
 0x2e8   : > { %2625 = vmatprep.mubr.msk.bf16.mxu0 %vm3501_vm1, %v3500_v9  ;;  %2633 = vmatprep.mubr.msk.bf16.mxu1 %vm3501_vm1, %v3500_v9 }
 0x2ea   : > { %2624 = vmatpush3.bf16.msra.mxu0 %v2956_v32  ;;  %2632 = vmatpush3.bf16.msra.mxu1 %v2957_v33 }
 0x2eb   : > { %2637 = vmatprep.subr.bf16.mxu0 %v3500_v9  ;;  %2645 = vmatprep.subr.bf16.mxu1 %v3500_v9 }
 0x2ed   : > { %2626 = vmatmul.mubr.msk.bf16.vlgmr.msra.gmra.mrb[12].mxu0 %vm662_vm0, %v4023_v23  ;;  %2634 = vmatmul.mubr.msk.bf16.vlgmr.msra.gmra.mrb[12].mxu1 %vm662_vm0, %v4023_v23 }
 0x2ee   : > { %2638 = vmatpush3.bf16.msra.mxu0 %v2958_v34  ;;  %2646 = vmatpush3.bf16.msra.mxu1 %v2959_v35 }
 0x2ef   : > { %2639 = vmatprep.subr.bf16.mxu0 %v3500_v9  ;;  %2647 = vmatprep.subr.bf16.mxu1 %v3500_v9 }
 0x2f0   : > { %2641 = vmatprep.mubr.msk.bf16.mxu0 %vm3501_vm1, %v3500_v9  ;;  %2649 = vmatprep.mubr.msk.bf16.mxu1 %vm3501_vm1, %v3500_v9 }
 0x2f2   : > { %2640 = vmatpush3.bf16.msra.mxu0 %v2960_v36  ;;  %2648 = vmatpush3.bf16.msra.mxu1 %v2961_v37 }
 0x2f3   : > { %2653 = vmatprep.subr.bf16.mxu0 %v3500_v9  ;;  %2661 = vmatprep.subr.bf16.mxu1 %v3500_v9 }
 0x2f5   : > { %2642 = vmatmul.mubr.msk.bf16.vlgmr.msra.gmra.mrb[16].mxu0 %vm662_vm0, %v4023_v23  ;;  %2650 = vmatmul.mubr.msk.bf16.vlgmr.msra.gmra.mrb[16].mxu1 %vm662_vm0, %v4023_v23 }
 0x2f6   : > { %2654 = vmatpush3.bf16.msra.mxu0 %v2962_v38  ;;  %2662 = vmatpush3.bf16.msra.mxu1 %v2963_v39 }
 0x2f7   : > { %2655 = vmatprep.subr.bf16.mxu0 %v3500_v9  ;;  %2663 = vmatprep.subr.bf16.mxu1 %v3500_v9 }
 0x2f8   : > { %2657 = vmatprep.mubr.msk.bf16.mxu0 %vm3501_vm1, %v3500_v9  ;;  %2665 = vmatprep.mubr.msk.bf16.mxu1 %vm3501_vm1, %v3500_v9 }
 0x2fa   : > { %2656 = vmatpush3.bf16.msra.mxu0 %v2964_v40  ;;  %2664 = vmatpush3.bf16.msra.mxu1 %v2965_v41 }
 0x2fb   : > { %2669 = vmatprep.subr.bf16.mxu0 %v3500_v9  ;;  %2675 = vmatprep.subr.bf16.mxu1 %v3500_v9 }
 0x2fd   : > { %2658 = vmatmul.mubr.msk.bf16.vlgmr.msra.gmra.mrb[20].mxu0 %vm662_vm0, %v4023_v23  ;;  %2666 = vmatmul.mubr.msk.bf16.vlgmr.msra.gmra.mrb[20].mxu1 %vm662_vm0, %v4023_v23 }
 0x2fe   : > { %2671 = vmatprep.mubr.msk.bf16.mxu0 %vm3501_vm1, %v3500_v9  ;;  %2677 = vmatprep.mubr.msk.bf16.mxu1 %vm3501_vm1, %v3500_v9 }
 0x3a8   : > { %v789_v42 = vpop.f32.mrb[0].mxu0  ;;  %v841_v43 = vpop.f32.mrb[0].mxu1 }
 0x3a9   : > { %v2579_v44 = vpop.f32.mrb[1].mxu0  ;;  %v2587_v45 = vpop.f32.mrb[1].mxu1  ;;  %v1367_v7 = vmul.f32 0.35355338, %v789_v42  ;;  %v1368_v8 = vmul.f32 0.35355338, %v841_v43 }
 0x3aa   : > { %v792_v46 = vpop.f32.mrb[2].mxu0  ;;  %v844_v47 = vpop.f32.mrb[2].mxu1 }
 0x3ab   : > { %v2580_v48 = vpop.f32.mrb[3].mxu0  ;;  %v2588_v49 = vpop.f32.mrb[3].mxu1  ;;  %v1371_v12 = vpack.c.bf16 %v1367_v7, %v1367_v7  ;;  %v1372_v13 = vpack.c.bf16 %v1368_v8, %v1368_v8 }
 0x3b0   : > { %v893_v50 = vpop.f32.mrb[4].mxu0  ;;  %v945_v51 = vpop.f32.mrb[4].mxu1 }
 0x3b1   : > { %v2595_v52 = vpop.f32.mrb[5].mxu0  ;;  %v2603_v53 = vpop.f32.mrb[5].mxu1  ;;  %v1369_v24 = vmul.f32 0.35355338, %v893_v50  ;;  %v1370_v25 = vmul.f32 0.35355338, %v945_v51 }
 0x3b2   : > { %v896_v54 = vpop.f32.mrb[6].mxu0  ;;  %v948_v55 = vpop.f32.mrb[6].mxu1 }
 0x3b3   : > { %v2596_v56 = vpop.f32.mrb[7].mxu0  ;;  %v2604_v57 = vpop.f32.mrb[7].mxu1  ;;  %v1373_v28 = vpack.c.bf16 %v1369_v24, %v1369_v24  ;;  %v1374_v29 = vpack.c.bf16 %v1370_v25, %v1370_v25 }
 0x3b8   : > { %v997_v58 = vpop.f32.mrb[8].mxu0  ;;  %v1049_v59 = vpop.f32.mrb[8].mxu1 }
 0x3b9   : > { %v1375_v60 = vpack.c.bf16 %v997_v58, %v997_v58  ;;  %v1376_v61 = vpack.c.bf16 %v1049_v59, %v1049_v59  ;;  %v2611_v62 = vpop.f32.mrb[9].mxu0  ;;  %v2619_v63 = vpop.f32.mrb[9].mxu1 }
 0x3ba   : > { %v1000_v1 = vpop.f32.mrb[10].mxu0  ;;  %v1052_v2 = vpop.f32.mrb[10].mxu1 }
 0x3bb   : > { %v1388_v3 = vsel %vm1383_vm2, %v1375_v60, 0  ;;  %v1434_v4 = vsel %vm1383_vm2, %v1376_v61, 0  ;;  %v2612_v5 = vpop.f32.mrb[11].mxu0  ;;  %v2620_v6 = vpop.f32.mrb[11].mxu1 }
 0x3bc   : > { %2670 = vmatpush3.bf16.xpose.msra.mxu0 %v1388_v3  ;;  %2676 = vmatpush3.bf16.xpose.msra.mxu1 %v1434_v4 }
 0x3bd   : > { %2681 = vmatprep.subr.bf16.mxu0 %v3500_v9  ;;  %2687 = vmatprep.subr.bf16.mxu1 %v3500_v9 }
 0x3c0   : > { %v1101_v10 = vpop.f32.mrb[12].mxu0  ;;  %v1153_v11 = vpop.f32.mrb[12].mxu1 }
 0x3c1   : > { %v1377_v14 = vpack.c.bf16 %v1101_v10, %v1101_v10  ;;  %v1378_v15 = vpack.c.bf16 %v1153_v11, %v1153_v11  ;;  %v2627_v16 = vpop.f32.mrb[13].mxu0  ;;  %v2635_v17 = vpop.f32.mrb[13].mxu1 }
 0x3c2   : > { %v1104_v18 = vpop.f32.mrb[14].mxu0  ;;  %v1156_v19 = vpop.f32.mrb[14].mxu1 }
 0x3c3   : > { %v1480_v20 = vsel %vm1383_vm2, %v1377_v14, 0  ;;  %v1526_v21 = vsel %vm1383_vm2, %v1378_v15, 0  ;;  %v2628_v22 = vpop.f32.mrb[15].mxu0  ;;  %v2636_v23 = vpop.f32.mrb[15].mxu1  ;;  %2672 = vmatmul.mubr.msk.bf16.vlgmr.msra.gmra.mrb[24].mxu0 %vm1383_vm2, %v1371_v12  ;;  %2678 = vmatmul.mubr.msk.bf16.vlgmr.msra.gmra.mrb[24].mxu1 %vm1383_vm2, %v1372_v13 }
 0x3c4   : > { %2682 = vmatpush3.bf16.xpose.msra.mxu0 %v1480_v20  ;;  %2688 = vmatpush3.bf16.xpose.msra.mxu1 %v1526_v21 }
 0x3c5   : > { %2683 = vmatprep.mubr.msk.bf16.mxu0 %vm3501_vm1, %v3500_v9  ;;  %2689 = vmatprep.mubr.msk.bf16.mxu1 %vm3501_vm1, %v3500_v9 }
 0x3c6   : > { %2693 = vmatprep.subr.bf16.mxu0 %v3500_v9  ;;  %2699 = vmatprep.subr.bf16.mxu1 %v3500_v9 }
 0x3c8   : > { %v1205_v26 = vpop.f32.mrb[16].mxu0  ;;  %v1257_v27 = vpop.f32.mrb[16].mxu1 }
 0x3c9   : > { %v1379_v30 = vpack.c.bf16 %v1205_v26, %v1205_v26  ;;  %v1380_v31 = vpack.c.bf16 %v1257_v27, %v1257_v27  ;;  %v2643_v32 = vpop.f32.mrb[17].mxu0  ;;  %v2651_v33 = vpop.f32.mrb[17].mxu1 }
 0x3ca   : > { %v1208_v34 = vpop.f32.mrb[18].mxu0  ;;  %v1260_v35 = vpop.f32.mrb[18].mxu1 }
 0x3cb   : > { %v1613_v36 = vsel %vm1611_vm3, %v1379_v30, 0  ;;  %v1659_v37 = vsel %vm1611_vm3, %v1380_v31, 0  ;;  %v2644_v38 = vpop.f32.mrb[19].mxu0  ;;  %v2652_v39 = vpop.f32.mrb[19].mxu1  ;;  %2684 = vmatmul.mubr.msk.bf16.vlgmr.msra.gmra.mrb[28].mxu0 %vm1383_vm2, %v1373_v28  ;;  %2690 = vmatmul.mubr.msk.bf16.vlgmr.msra.gmra.mrb[28].mxu1 %vm1383_vm2, %v1374_v29  ;;  %v1801_v34 = vld [vmem:[#allocation13] sm:$0xf] }
 0x3cc   : > { %2694 = vmatpush3.bf16.msra.mxu0 %v1613_v36  ;;  %2700 = vmatpush3.bf16.msra.mxu1 %v1659_v37  ;;  %v1813_v35 = vsel %vm1611_vm3, %v1801_v34, 0  ;;  %v1802_v36 = vld [vmem:[#allocation13 + $0x4] sm:$0xf] }
 0x3cd   : > { %2695 = vmatprep.mubr.msk.bf16.mxu0 %vm3501_vm1, %v3500_v9  ;;  %2705 = vmatprep.subr.bf16.mxu0 %v3500_v9  ;;  %v1859_v37 = vsel %vm1611_vm3, %v1802_v36, 0 }
 0x3ce   : > { %2701 = vmatprep.mubr.msk.bf16.mxu1 %vm3501_vm1, %v3500_v9  ;;  %2711 = vmatprep.subr.bf16.mxu1 %v3500_v9 }
 0x3d0   : > { %v1309_v40 = vpop.f32.mrb[20].mxu0  ;;  %v4117_v41 = vpop.f32.mrb[20].mxu1 }
 0x3d1   : > { %v2659_v42 = vpop.f32.mrb[21].mxu0  ;;  %v2667_v43 = vpop.f32.mrb[21].mxu1  ;;  %v1381_v18 = vpack.c.bf16 %v1309_v40, %v1309_v40  ;;  %v1382_v23 = vpack.c.bf16 %v4117_v41, %v4117_v41 }
 0x3d2   : > { %v1312_v44 = vpop.f32.mrb[22].mxu0  ;;  %v1364_v45 = vpop.f32.mrb[22].mxu1 }
 0x3d3   : > { %v2660_v46 = vpop.f32.mrb[23].mxu0  ;;  %v2668_v47 = vpop.f32.mrb[23].mxu1  ;;  %v1705_v22 = vsel %vm1611_vm3, %v1381_v18, 0  ;;  %v1751_v27 = vsel %vm1611_vm3, %v1382_v23, 0  ;;  %v1803_v44 = vld [vmem:[#allocation13 + $0x8] sm:$0xf] }
 0x496   : > { %v1424_v48 = vpop.f32.mrb[24].mxu0  ;;  %v1470_v49 = vpop.f32.mrb[24].mxu1 }
 0x497   : > { %v2673_v50 = vpop.f32.mrb[25].mxu0  ;;  %v2679_v51 = vpop.f32.mrb[25].mxu1  ;;  %v1568_v52 = vsel %vm1383_vm2, %v1424_v48, -inf  ;;  %v1571_v57 = vsel %vm1383_vm2, %v1470_v49, -inf }
 0x498   : > { %v1473_v53 = vpop.f32.mrb[26].mxu1  ;;  %1569 = vmax.xlane.f32.xlu1 %v1568_v52  ;;  %v1427_v54 = vpop.f32.mrb[26].mxu0  ;;  %v1905_v50 = vsel %vm1611_vm3, %v1803_v44, 0  ;;  %v2966_v44 = vld [vmem:[#allocation19] sm:$0xff]  }
 0x499   : > { %v2674_v55 = vpop.f32.mrb[27].mxu0  ;;  %v2680_v56 = vpop.f32.mrb[27].mxu1  ;;  %v1804_v53 = vld [vmem:[#allocation13 + $0xc] sm:$0xf] }
 0x49c   : > { %1572 = vmax.xlane.f32.xlu1 %v1571_v57 }
 0x49e   : > { %v1516_v58 = vpop.f32.mrb[28].mxu0  ;;  %v1562_v59 = vpop.f32.mrb[28].mxu1 }
 0x49f   : > { %v2685_v60 = vpop.f32.mrb[29].mxu0  ;;  %v2691_v61 = vpop.f32.mrb[29].mxu1  ;;  %v1577_v62 = vsel %vm1383_vm2, %v1562_v59, -inf  ;;  %v1574_v63 = vsel %vm1383_vm2, %v1516_v58, -inf }
 0x4a0   : > { %v1565_v1 = vpop.f32.mrb[30].mxu1  ;;  %1578 = vmax.xlane.f32.xlu1 %v1577_v62  ;;  %1575 = vmax.xlane.f32.xlu0 %v1574_v63  ;;  %v1519_v2 = vpop.f32.mrb[30].mxu0 }
 0x4a1   : > { %v2686_v3 = vpop.f32.mrb[31].mxu0  ;;  %v2692_v4 = vpop.f32.mrb[31].mxu1 }
 0x525   : > { %v1570_v5 = vpop.xlane.xlu1 %1569 }
 0x526   : > { %v1580_v6 = vsub.f32 %v1424_v48, %v1570_v5 }
 0x528   : > { %v1584_v7 = vmul.f32 1.442695, %v1580_v6 }
 0x529   : > { %v1573_v8 = vpop.xlane.xlu1 %1572 }
 0x52a   : > { %2974 = vpow2.f32 %v1584_v7  ;;  %v1581_v10 = vsub.f32 %v1470_v49, %v1573_v8 }
 0x52c   : > { %v1586_v11 = vmul.f32 1.442695, %v1581_v10 }
 0x52d   : > { %v1579_v12 = vpop.xlane.xlu1 %1578  ;;  %v1576_v13 = vpop.xlane.xlu0 %1575 }
 0x52e   : > { %2976 = vpow2.f32 %v1586_v11  ;;  %v1583_v14 = vsub.f32 %v1562_v59, %v1579_v12  ;;  %v1582_v15 = vsub.f32 %v1516_v58, %v1576_v13  ;;  %v1951_v59 = vsel %vm1611_vm3, %v1804_v53, 0 }
 0x530   : > { %v1590_v16 = vmul.f32 1.442695, %v1583_v14  ;;  %v1588_v17 = vmul.f32 1.442695, %v1582_v15 }
 0x532   : > { %2978 = vpow2.f32 %v1590_v16 }
 0x533   : > { %2980 = vpow2.f32 %v1588_v17 }
 0x534   : > { %v2975_v19 = vpop.eup %2974 }
 0x535   : > { %v1592_v20 = vsel %vm1383_vm2, %v2975_v19, 0.0  ;;  %v1604_v21 = vpack.c.bf16 %v2975_v19, %v2975_v19 }
 0x536   : > { %1593 = vadd.xlane.f32.xlu0 %v1592_v20 }
 0x537   : > { %2696 = vmatmul.mubr.msk.bf16.vlgmr.msra.gmra.mrb[32].mxu0 %vm1383_vm2, %v1604_v21 }
 0x538   : > { %v2977_v24 = vpop.eup %2976  ;;  %2706 = vmatpush3.bf16.msra.mxu0 %v1705_v22  ;;  %2707 = vmatprep.mubr.msk.bf16.mxu0 %vm3501_vm1, %v3500_v9 }
 0x539   : > { %v1595_v25 = vsel %vm1383_vm2, %v2977_v24, 0.0  ;;  %v1605_v26 = vpack.c.bf16 %v2977_v24, %v2977_v24  ;;  %2717 = vmatprep.subr.bf16.mxu0 %v3500_v9 }
 0x53a   : > { %1596 = vadd.xlane.f32.xlu1 %v1595_v25 }
 0x53b   : > { %2702 = vmatmul.mubr.msk.bf16.vlgmr.msra.gmra.mrb[32].mxu1 %vm1383_vm2, %v1605_v26 }
 0x53c   : > { %v2979_v28 = vpop.eup %2978  ;;  %2712 = vmatpush3.bf16.msra.mxu1 %v1751_v27  ;;  %2713 = vmatprep.mubr.msk.bf16.mxu1 %vm3501_vm1, %v3500_v9 }
 0x53d   : > { %v2981_v29 = vpop.eup %2980  ;;  %v1601_v30 = vsel %vm1383_vm2, %v2979_v28, 0.0  ;;  %2723 = vmatprep.subr.bf16.mxu1 %v3500_v9  ;;  %v1607_v33 = vpack.c.bf16 %v2979_v28, %v2979_v28 }
 0x53e   : > { %1602 = vadd.xlane.f32.xlu1 %v1601_v30  ;;  %v1598_v31 = vsel %vm1383_vm2, %v2981_v29, 0.0  ;;  %v1606_v32 = vpack.c.bf16 %v2981_v29, %v2981_v29 }
 0x53f   : > { %1599 = vadd.xlane.f32.xlu0 %v1598_v31 }
 0x540   : > { %2708 = vmatmul.mubr.msk.bf16.vlgmr.msra.gmra.mrb[36].mxu0 %vm1383_vm2, %v1606_v32 }
 0x541   : > { %2719 = vmatprep.mubr.msk.bf16.mxu0 %vm3501_vm1, %v3500_v9  ;;  %2718 = vmatpush3.bf16.msra.mxu0 %v1813_v35  ;;  %v2488_v35 = vld [vmem:[#allocation14] ss:$0 sm:$0xff] }
 0x542   : > { %2729 = vmatprep.subr.bf16.mxu0 %v3500_v9 }
 0x543   : > { %2714 = vmatmul.mubr.msk.bf16.vlgmr.msra.gmra.mrb[36].mxu1 %vm1383_vm2, %v1607_v33 }
 0x544   : > { %2725 = vmatprep.mubr.msk.bf16.mxu1 %vm3501_vm1, %v3500_v9  ;;  %2724 = vmatpush3.bf16.msra.mxu1 %v1859_v37 }
 0x545   : > { %2735 = vmatprep.subr.bf16.mxu1 %v3500_v9 }
 0x5c3   : > { %v1594_v38 = vpop.xlane.xlu0 %1593 }
 0x5c4   : > { %2982 = vrcp.f32 %v1594_v38 }
 0x5c7   : > { %v1597_v39 = vpop.xlane.xlu1 %1596 }
 0x5c8   : > { %2984 = vrcp.f32 %v1597_v39 }
 0x5cb   : > { %v1603_v41 = vpop.xlane.xlu1 %1602 }
 0x5cc   : > { %v1600_v40 = vpop.xlane.xlu0 %1599 }
 0x5cd   : > { %2986 = vrcp.f32 %v1600_v40 }
 0x5ce   : > { %v2983_v42 = vpop.eup %2982  ;;  %2988 = vrcp.f32 %v1603_v41 }
 0x5d2   : > { %v2985_v51 = vpop.eup %2984 }
 0x5d7   : > { %v2987_v60 = vpop.eup %2986 }
 0x5d8   : > { %v2989_v2 = vpop.eup %2988 }
 0x60a   : > { %v1649_v43 = vpop.f32.mrb[32].mxu0 }
 0x60b   : > { %v1797_v45 = vmul.f32 %v2983_v42, %v1649_v43  ;;  %v2697_v46 = vpop.f32.mrb[33].mxu0 }
 0x60c   : > { %v1652_v47 = vpop.f32.mrb[34].mxu0 }
 0x60d   : > { %v1805_v48 = vpack.c.bf16 %v1797_v45, %v1797_v45  ;;  %v2698_v49 = vpop.f32.mrb[35].mxu0  ;;  %v2967_v45 = vld [vmem:[#allocation19 + $0x8] sm:$0xff]  }
 0x60e   : > { %v1695_v52 = vpop.f32.mrb[32].mxu1  ;;  %v2489_v49 = vld [vmem:[#allocation16] ss:$0 sm:$0xff] }
 0x60f   : > { %v1798_v54 = vmul.f32 %v2985_v51, %v1695_v52  ;;  %v2703_v55 = vpop.f32.mrb[33].mxu1  ;;  %2720 = vmatmul.mubr.msk.bf16.vlgmr.msra.gmra.mrb[40].mxu0 %vm1383_vm2, %v1805_v48  ;;  %v2490_v51 = vld [vmem:[#allocation17] ss:$0 sm:$0xff] }
 0x610   : > { %v1698_v56 = vpop.f32.mrb[34].mxu1  ;;  %2730 = vmatpush3.bf16.msra.mxu0 %v1905_v50  ;;  %2731 = vmatprep.mubr.msk.bf16.mxu0 %vm3501_vm1, %v3500_v9  ;;  %v2968_v55 = vld [vmem:[#allocation22] sm:$0xff]  }
 0x611   : > { %v1806_v57 = vpack.c.bf16 %v1798_v54, %v1798_v54  ;;  %v2704_v58 = vpop.f32.mrb[35].mxu1  ;;  %2741 = vmatprep.subr.bf16.mxu0 %v3500_v9  ;;  %v2969_v56 = vld [vmem:[#allocation22 + $0x8] sm:$0xff]  }
 0x612   : > { %v2971_v58 = vld [vmem:[#allocation22 + $0x18] sm:$0xff]  }
 0x613   : > { %v1741_v61 = vpop.f32.mrb[36].mxu0  ;;  %2726 = vmatmul.mubr.msk.bf16.vlgmr.msra.gmra.mrb[40].mxu1 %vm1383_vm2, %v1806_v57  ;;  %v2970_v57 = vld [vmem:[#allocation22 + $0x10] sm:$0xff]  }
 0x614   : > { %v1799_v62 = vmul.f32 %v2987_v60, %v1741_v61  ;;  %v2709_v63 = vpop.f32.mrb[37].mxu0  ;;  %2736 = vmatpush3.bf16.msra.mxu1 %v1951_v59  ;;  %2737 = vmatprep.mubr.msk.bf16.mxu1 %vm3501_vm1, %v3500_v9  ;;  %v2491_v59 = vld [vmem:[#allocation20] ss:$0 sm:$0xff] }
 0x615   : > { %v1744_v1 = vpop.f32.mrb[38].mxu0  ;;  %2749 = vmatprep.subr.bf16.mxu1 %v3500_v9 }
 0x616   : > { %v1807_v3 = vpack.c.bf16 %v1799_v62, %v1799_v62  ;;  %v2710_v4 = vpop.f32.mrb[39].mxu0  ;;  %v1787_v5 = vpop.f32.mrb[36].mxu1 }
 0x617   : > { %v1800_v6 = vmul.f32 %v2989_v2, %v1787_v5  ;;  %v2715_v7 = vpop.f32.mrb[37].mxu1 }
 0x618   : > { %2732 = vmatmul.mubr.msk.bf16.vlgmr.msra.gmra.mrb[44].mxu0 %vm1383_vm2, %v1807_v3  ;;  %v1790_v8 = vpop.f32.mrb[38].mxu1 }
 0x619   : > { %v1808_v10 = vpack.c.bf16 %v1800_v6, %v1800_v6  ;;  %v2716_v11 = vpop.f32.mrb[39].mxu1  ;;  %2745 = vmatprep.mubr.msk.bf16.mxu0 %vm3501_vm1, %v3500_v9  ;;  %2742 = vmatpush3.bf16.msra.mxu0 %v2966_v44 }
 0x61a   : > { %2743 = vmatprep.subr.bf16.mxu0 %v3500_v9 }
 0x61b   : > { %2738 = vmatmul.mubr.msk.bf16.vlgmr.msra.gmra.mrb[44].mxu1 %vm1383_vm2, %v1808_v10 }
 0x61c   : > { %2757 = vmatprep.mubr.msk.bf16.mxu1 %vm3501_vm1, %v3500_v9  ;;  %2750 = vmatpush3.bf16.msra.mxu1 %v2968_v55 }
 0x61d   : > { %2744 = vmatpush3.bf16.msra.mxu0 %v2967_v45  ;;  %2751 = vmatprep.subr.bf16.mxu1 %v3500_v9 }
 0x620   : > { %2752 = vmatpush3.bf16.msra.mxu1 %v2969_v56 }
 0x621   : > { %2753 = vmatprep.subr.bf16.mxu1 %v3500_v9 }
 0x624   : > { %2754 = vmatpush3.bf16.msra.mxu1 %v2970_v57 }
 0x625   : > { %2755 = vmatprep.subr.bf16.mxu1 %v3500_v9  ;;  %v2495_v9 = vld [vmem:[#allocation23] ss:$0 sm:$0xff] }
 0x628   : > { %2756 = vmatpush3.bf16.msra.mxu1 %v2971_v58 }
 0x6e2   : > { %v1849_v12 = vpop.f32.mrb[40].mxu0 }
 0x6e3   : > { %v2721_v13 = vpop.f32.mrb[41].mxu0  ;;  %v1993_v17 = vsel %vm662_vm0, %v1849_v12, 0.0 }
 0x6e4   : > { %v1852_v14 = vpop.f32.mrb[42].mxu0 }
 0x6e5   : > { %v2722_v15 = vpop.f32.mrb[43].mxu0 }
 0x6e6   : > { %v1895_v16 = vpop.f32.mrb[40].mxu1 }
 0x6e7   : > { %v1994_v18 = vsel %vm662_vm0, %v1895_v16, 0.0  ;;  %v2727_v19 = vpop.f32.mrb[41].mxu1 }
 0x6e8   : > { %v1995_v20 = vadd.f32 %v1994_v18, %v1993_v17  ;;  %v1898_v21 = vpop.f32.mrb[42].mxu1 }
 0x6e9   : > { %v2728_v22 = vpop.f32.mrb[43].mxu1 }
 0x6eb   : > { %v1941_v23 = vpop.f32.mrb[44].mxu0 }
 0x6ec   : > { %v1996_v24 = vsel %vm662_vm0, %v1941_v23, 0.0  ;;  %v2733_v25 = vpop.f32.mrb[45].mxu0 }
 0x6ed   : > { %v1997_v26 = vadd.f32 %v1996_v24, %v1995_v20  ;;  %v1944_v27 = vpop.f32.mrb[46].mxu0 }
 0x6ee   : > { %v2734_v28 = vpop.f32.mrb[47].mxu0  ;;  %v1987_v29 = vpop.f32.mrb[44].mxu1 }
 0x6ef   : > { %v1998_v30 = vsel %vm662_vm0, %v1987_v29, 0.0  ;;  %v2739_v31 = vpop.f32.mrb[45].mxu1 }
 0x6f0   : > { %v1999_v32 = vadd.f32 %v1998_v30, %v1997_v26  ;;  %v1990_v33 = vpop.f32.mrb[46].mxu1 }
 0x6f1   : > { %v2740_v34 = vpop.f32.mrb[47].mxu1 }
 0x6f2   : > { %v2000_v36 = vadd.f32 %v1999_v32, %v4007_v0 }
 0x6f4   : > { %v2008_v37 = vadd.f32 %v2488_v35, %v2000_v36 }
 0x6f6   : > { %v2011_v38 = vsel %vm662_vm0, %v2008_v37, 0.0 }
 0x6f7   : > { %2012 = vadd.xlane.f32.xlu0 %v2011_v38 }
 0x784   : > { %v2013_v39 = vpop.xlane.xlu0 %2012 }
 0x785   : > { %v2014_v40 = vmul.f32 0.03125, %v2013_v39 }
 0x787   : > { %v2015_v41 = vsub.f32 %v2008_v37, %v2014_v40 }
 0x789   : > { %v2016_v42 = vmul.f32 %v2015_v41, %v2015_v41 }
 0x78b   : > { %v2017_v43 = vsel %vm662_vm0, %v2016_v42, 0.0 }
 0x78c   : > { %2018 = vadd.xlane.f32.xlu1 %v2017_v43 }
 0x819   : > { %v2019_v46 = vpop.xlane.xlu1 %2018 }
 0x81a   : > { %v2020_v47 = vmul.f32 0.03125, %v2019_v46 }
 0x81c   : > { %v2021_v0 = vadd.f32 1e-05, %v2020_v47 }
 0x81e   : > { %2990 = vrsqrt.f32 %v2021_v0 }
 0x828   : > { %v2991_v48 = vpop.eup %2990 }
 0x829   : > { %v2023_v50 = vmul.f32 %v2991_v48, %v2015_v41 }
 0x82b   : > { %v2030_v52 = vmul.f32 %v2489_v49, %v2023_v50 }
 0x82d   : > { %v2037_v53 = vadd.f32 %v2490_v51, %v2030_v52 }
 0x82f   : > { %v2038_v54 = vpack.c.bf16 %v2037_v53, %v2037_v53 }
 0x831   : > { %2746 = vmatmul.mubr.msk.bf16.vlgmr.msra.gmra.mrb[48].mxu0 %vm662_vm0, %v2038_v54 }
 0x904   : > { %v2099_v60 = vpop.f32.mrb[48].mxu0 }
 0x905   : > { %v2100_v61 = vadd.f32 %v2491_v59, %v2099_v60  ;;  %v2747_v62 = vpop.f32.mrb[49].mxu0 }
 0x906   : > { %v2102_v63 = vpop.f32.mrb[50].mxu0 }
 0x907   : > { %v2106_v1 = vmul.f32 0.70710677, %v2100_v61  ;;  %v2748_v2 = vpop.f32.mrb[51].mxu0  ;;  %v2105_v4 = vmul.f32 0.5, %v2100_v61 }
 0x909   : > { %2992 = verf.f32 %v2106_v1 }
 0x913   : > { %v2993_v3 = vpop.eup %2992 }
 0x914   : > { %v2108_v5 = vadd.f32 1.0, %v2993_v3 }
 0x916   : > { %v2109_v6 = vmul.f32 %v2108_v5, %v2105_v4 }
 0x918   : > { %v2110_v7 = vpack.c.bf16 %v2109_v6, %v2109_v6 }
 0x91a   : > { %2758 = vmatmul.mubr.msk.bf16.vlgmr.msra.gmra.mrb[48].mxu1 %vm2150_vm4, %v2110_v7 }
 0x9ed   : > { %v2188_v8 = vpop.f32.mrb[48].mxu1 }
 0x9ee   : > { %v2189_v10 = vadd.f32 %v2495_v9, %v2188_v8  ;;  %v2759_v11 = vpop.f32.mrb[49].mxu1 }
 0x9ef   : > { %v2191_v12 = vpop.f32.mrb[50].mxu1 }
 0x9f0   : > { %v2194_v13 = vadd.f32 %v2189_v10, %v2008_v37  ;;  %v2760_v14 = vpop.f32.mrb[51].mxu1 }
 0x9f2   : > { %2195 = vst.msk [vmem:[%s657_s1] sm:$0xff] %vm662_vm0, %v2194_v13 }
 0x9f3   : > { %3401 = shalt.err (!%p3398_p10)
}
 0x9f4   : > { %s3402_s17 = scalar_lea.hbm %s4183_s25, 128  ;;  %s3406_s27 = scalar_lea.hbm %s4291_s0, 256 }
 0x9f5   : > { %p3403_p4 = scmp.ne.s32.totalorder %s4183_s25, %s3402_s17  ;;  %p3407_p3 = scmp.lt.u32.totalorder %s4183_s25, %s4291_s0 }
 0x9f6   : > { %p3408_p2 = scmp.lt.u32.totalorder %s3406_s27, %s3402_s17  ;;  %p3410_p6 = scmp.lt.u32.totalorder %s3402_s17, %s4183_s25 }
 0x9f7   : > { %p3404_p13 = pnand %p3403_p4, %p4292_p11 }
 0x9f8   : > { %p3409_p0 = por %p3408_p2, %p3407_p3 }
 0x9f9   : > { %p3405_p1 = pneg %p3404_p13 }
 0x9fa   : > { %p3411_p12 = por %p3410_p6, %p3409_p0 }
 0x9fc   : > { %p3412_p8 = pnand %p3411_p12, %p3405_p1 }
 0x9fe   : > { %3415 = shalt.err (!%p3412_p8)
}
 0x9ff   : > { %2815 = dma.vmem_to_hbm [thread:$0]  (%p4292_p11), %s4185_s14, 128, %s4183_s25, %s2197_s29  }
 0xa00 PF: > { %s4293_s2 = sld [smem:[#allocation35_spill]]  ;;  %p4294_p5 = scmp.ne.s32.totalorder %s4271_s3, 0 }
 0xa01   : > { %p4295_p9 = scmp.ge.s32.totalorder %s3482_s16, 2 }
 0xa03   : > { %p2862_p7 = pnand %p4295_p9, %p4294_p5 }
 0xa06   : > { %s2222_s21 = sand.u32 1, %s4293_s2  }
 0xa07   : > { %s2223_s18 = scalar_lea.sflag [#allocation4], %s2222_s21 }
 0xa08   : > { %3465 = dma.done.wait (!%p2862_p7), %s2223_s18, 128  }
 0xa09   : > { %3467 = vsyncadd (!%p2862_p7), %s2223_s18, 4294967168  ;;  %p34_p10 = scmp.ge.s32.totalorder %s3899_s23, 4   ;;  %s4296_s29 = smov %s3474_s30 }
 0xa0a   : > { %s4297_s30 = smov %s3478_s15  ;;  %s4298_s15 = smov %s3911_s20 }
 0xa0b   : > { %s4299_s16 = smov %s3899_s23  ;;  %36 = sbr.rel (!%p34_p10) target bundleno = 18 (0x12), region = 173 }
 0xa12   :  { %2228 = vsyncpa [#allocation3], 1 }
 0xa13   :  { %2230 = vsyncpa [#allocation3 + $0x1], 1 }
 0xa14   :  { %2231 = vsyncpa [#allocation6], 1 }
 0xa15   :  { %2232 = vsyncpa [#allocation9], 1 }
 0xa16   :  { %2233 = vsyncpa [#allocation12], 1 }
 0xa17   :  { %2234 = vsyncpa [#allocation15], 1 }
 0xa18   :  { %2235 = vsyncpa [#allocation18], 1 }
 0xa19   :  { %2236 = vsyncpa [#allocation21], 1 }
 0xa1a   :  { %2237 = vsyncpa [#allocation24], 1 }
 0xa1b   :  { %2238 = vsyncpa [#allocation4], 1 }
 0xa1c   :  { %2240 = vsyncpa [#allocation4 + $0x1], 1 }

</bundles_post_ra>
